<compile_context>
chip_gen: v7x
topology: tpu7x:2x2x1
jax: 0.10.0
libtpu: 0.0.40
codegen_flags: <defaults>
</compile_context>

<pallas_src>
import math
import jax
import jax.numpy as jnp
from jax.experimental import pallas as pl
from jax.experimental.pallas import tpu as pltpu

# -------- model / problem sizes (small, consistent with the module) --------
D   = 32          # size (d_model)
H   = 4           # args.h
DK  = D // H      # d_k
DFF = 4 * D       # PFFN hidden (size * 4)
S   = 8           # sequence length
B   = 2           # batch
LN_EPS  = 1e-5    # torch LayerNorm default
NEG_INF = -1.0e9  # matches masked_fill(mask, -1e9)


# ----------------------------- kernel helpers ------------------------------
def _erf(x):
    # float32-accurate erf (Abramowitz & Stegun 7.1.26, |err| < 1.5e-7).
    # Matches torch's exact (erf-based) F.gelu to f32 precision; kept in f32
    # because v5e's VPU/EUP have no bf16 path.
    # TODO(synk): on v6e/v7x, if exact erf parity is not required, switch to
    # the tanh GELU approximation (single EUP tanh instead of this polynomial).
    a1, a2, a3, a4, a5 = (0.254829592, -0.284496736, 1.421413741,
                          -1.453152027, 1.061405429)
    p = 0.3275911
    sign = jnp.where(x >= 0.0, 1.0, -1.0)
    ax = jnp.abs(x)
    t = 1.0 / (1.0 + p * ax)
    poly = ((((a5 * t + a4) * t + a3) * t + a2) * t + a1) * t
    return sign * (1.0 - poly * jnp.exp(-ax * ax))


def _gelu(x):
    # exact GELU: x * 0.5 * (1 + erf(x / sqrt(2)))   (torch F.gelu default)
    return 0.5 * x * (1.0 + _erf(x * (1.0 / math.sqrt(2.0))))


def _layer_norm(x, gamma, beta):
    mean = jnp.mean(x, axis=-1, keepdims=True)
    var = jnp.mean(jnp.square(x - mean), axis=-1, keepdims=True)
    return (x - mean) * jax.lax.rsqrt(var + LN_EPS) * gamma + beta


# ------------------------------- the kernel --------------------------------
def encoder_layer_kernel(x_ref, bias_ref,
                         w_qkv_ref, w_o_ref, w_1_ref, w_2_ref,
                         b_wide_ref, vec_ref,
                         o_ref):
    _, Sn, Dn = x_ref.shape                                 # block is (1, S, D)
    bf16 = jnp.bfloat16

    xf = x_ref[...].reshape(Sn, Dn)                         # (S, D) f32

    # ---- unpack packed bias / LayerNorm slabs ----
    vecs = vec_ref[...]                                     # (6, D) f32
    g1, be1, g2, be2, bo, b2 = (vecs[i:i + 1] for i in range(6))
    b_wide = b_wide_ref[...]                                # (2, DFF) f32
    b_qkv = b_wide[0:1, :3 * Dn]                            # (1, 3D)
    b1 = b_wide[1:2, :]                                     # (1, DFF)

    # additive attention-mask bias (0 or -1e9); broadcasts over queries/heads
    bias = bias_ref[...].reshape(1, Sn)                     # (1, S)

    # ---- sublayer 0 :  x + MHSA(LN(x)) ----
    xn = _layer_norm(xf, g1, be1)                           # (S, D) f32

    # fused Q/K/V projection: one wide MXU matmul (bf16 operands, f32 acc)
    qkv = jnp.dot(xn.astype(bf16), w_qkv_ref[...].astype(bf16),
                  preferred_element_type=jnp.float32) + b_qkv     # (S, 3D)

    scale = 1.0 / math.sqrt(DK)
    heads = []
    for h in range(H):                                      # H = 4, unrolled
        q = qkv[:,          h * DK:         (h + 1) * DK]   # (S, DK)
        k = qkv[:,     Dn + h * DK:    Dn + (h + 1) * DK]   # (S, DK)
        v = qkv[:, 2 * Dn + h * DK: 2 * Dn + (h + 1) * DK]  # (S, DK)

        # 8x8x8 contraction is pure MXU latency at this size -> VPU:
        # scores[i,j] = sum_d q[i,d]*k[j,d]
        s = jnp.sum(q[:, None, :] * k[None, :, :], axis=-1)       # (S, S)
        # torch: masked_fill(-1e9) then /sqrt(d_k); additive -1e9 bias gives
        # identical softmax output (masked keys underflow to exactly 0).
        s = s * scale + bias
        s = s - jnp.max(s, axis=-1, keepdims=True)
        p = jnp.exp(s)
        p = p * pl.reciprocal(jnp.sum(p, axis=-1, keepdims=True),
                              approx=True)
        # PV on the VPU: out[i,d] = sum_j p[i,j]*v[j,d]
        heads.append(jnp.sum(p[:, :, None] * v[None, :, :], axis=1))  # (S,DK)

    # concat(heads) along features == torch .transpose(1,2).view(nb,-1,h*d_k)
    attn = jnp.concatenate(heads, axis=-1)                  # (S, D)
    proj = jnp.dot(attn.astype(bf16), w_o_ref[...].astype(bf16),
                   preferred_element_type=jnp.float32) + bo
    x1 = xf + proj

    # ---- sublayer 1 :  x + PFFN(LN(x)) ----
    xn2 = _layer_norm(x1, g2, be2)
    hdd = jnp.dot(xn2.astype(bf16), w_1_ref[...].astype(bf16),
                  preferred_element_type=jnp.float32) + b1        # (S, DFF)
    hdd = _gelu(hdd)
    ffn = jnp.dot(hdd.astype(bf16), w_2_ref[...].astype(bf16),
                  preferred_element_type=jnp.float32) + b2        # (S, D)

    # TODO(synk): for large rows, present a lane-dense (rows, k*128) output
    # slab instead of a 32-lane store; at 2 KiB the difference is noise.
    o_ref[...] = (x1 + ffn).reshape(1, Sn, Dn)


# ------------------------------ JAX wrapper --------------------------------
PARAM_ORDER = ["w_qkv", "w_o", "w_1", "w_2", "b_wide", "vecs"]


def init_params(key):
    """Deterministic init mirroring torch defaults (Linear: U(-1/sqrt(fan_in),..),
    LayerNorm: weight=1, bias=0), packed into a few kernel-friendly slabs.
    Master weights kept in f32; bf16 casts happen on matmul operands in-kernel."""
    ks = jax.random.split(key, 12)

    def u(k, fan_in, shape):
        b = 1.0 / math.sqrt(fan_in)
        return jax.random.uniform(k, shape, jnp.float32, -b, b)

    wq = u(ks[0], D, (D, D));      bq = u(ks[1], D, (D,))
    wk = u(ks[2], D, (D, D));      bk = u(ks[3], D, (D,))
    wv = u(ks[4], D, (D, D));      bv = u(ks[5], D, (D,))
    wo = u(ks[6], D, (D, D));      bo = u(ks[7], D, (D,))
    w1 = u(ks[8], D, (D, DFF));    b1 = u(ks[9], D, (DFF,))
    w2 = u(ks[10], DFF, (DFF, D)); b2 = u(ks[11], DFF, (D,))
    g1 = jnp.ones((D,), jnp.float32);  be1 = jnp.zeros((D,), jnp.float32)
    g2 = jnp.ones((D,), jnp.float32);  be2 = jnp.zeros((D,), jnp.float32)

    # ---- pack for the kernel (all f32 master copies) ----
    w_qkv = jnp.concatenate([wq, wk, wv], axis=1)                    # (D, 3D)
    b_wide = jnp.stack([
        jnp.concatenate([bq, bk, bv, jnp.zeros((DFF - 3 * D,), jnp.float32)]),
        b1,
    ]).astype(jnp.float32)                                           # (2, DFF)
    vecs = jnp.stack([g1, be1, g2, be2, bo, b2]).astype(jnp.float32)  # (6, D)

    return dict(w_qkv=w_qkv, w_o=wo, w_1=w1, w_2=w2,
                b_wide=b_wide, vecs=vecs)


def _resident_spec(shape):
    nd = len(shape)
    return pl.BlockSpec(tuple(shape), lambda b, _nd=nd: (0,) * _nd)


def encoder_layer(x, mask, params):
    """x: (B, S, D) float32.  mask: (B, 1, S) float32, 1.0 => masked key."""
    Bn, Sn, Dn = x.shape
    flat = [params[k] for k in PARAM_ORDER]

    # mask -> additive bias, computed once in the wrapper.
    mask_bias = (mask.astype(jnp.float32) * NEG_INF).reshape(Bn, 1, Sn)

    flops = (2 * Bn * Sn * (Dn * 3 * Dn + Dn * Dn + 2 * Dn * DFF)
             + 2 * 2 * Bn * H * Sn * Sn * DK)
    transcendentals = Bn * Sn * DFF + Bn * H * Sn * Sn + Bn * H * Sn
    bytes_accessed = (2 * x.size + mask_bias.size) * 4 + sum(
        int(p.size) * p.dtype.itemsize for p in flat)

    # TODO(synk): when N EncoderLayers are stacked, fuse them into ONE
    # pallas_call (leading layer grid axis over stacked parameter slabs,
    # activations resident in a VMEM scratch accumulator) to amortize launch
    # overhead; at ~60 KiB total this single layer is dispatch-bound.
    # TODO(synk): at real model sizes (D>=1024, long S) re-tile rows over a
    # grid, keep weights resident and set an explicit vmem_limit_bytes
    # (v7x has 64 MiB physical VMEM vs 128 MiB on v5e/v6e).
    return pl.pallas_call(
        encoder_layer_kernel,
        out_shape=jax.ShapeDtypeStruct((Bn, Sn, Dn), jnp.float32),
        grid=(Bn,),
        in_specs=[pl.BlockSpec((1, Sn, Dn), lambda b: (b, 0, 0)),
                  pl.BlockSpec((1, 1, Sn), lambda b: (b, 0, 0))]
                 + [_resident_spec(p.shape) for p in flat],
        out_specs=pl.BlockSpec((1, Sn, Dn), lambda b: (b, 0, 0)),
        compiler_params=pltpu.CompilerParams(
            dimension_semantics=("parallel",)),
        cost_estimate=pl.CostEstimate(flops=flops,
                                      transcendentals=transcendentals,
                                      bytes_accessed=bytes_accessed),
    )(x, mask_bias, *flat)


# ---------------------------------- main -----------------------------------
if __name__ == "__main__":
    key = jax.random.PRNGKey(0)
    kx, kp = jax.random.split(key)
    x = jax.random.normal(kx, (B, S, D), jnp.float32)
    # key-padding style mask (broadcasts over heads & query positions, same
    # semantics as torch masked_fill): batch 1 masks its last 2 keys.
    mask = jnp.zeros((B, 1, S), jnp.float32).at[1, 0, S - 2:].set(1.0)

    params = init_params(kp)
    out = encoder_layer(x, mask, params)
    jax.block_until_ready(out)
    assert out.shape == (B, S, D) and out.dtype == jnp.float32
    assert bool(jnp.all(jnp.isfinite(out)))
    print("KERNEL_OK")
</pallas_src>

<mosaic_0001>
module attributes {stable_mosaic.version = 11 : i64} {
  func.func @encoder_layer_kernel(%arg0: i32, %arg1: memref<1x8x32xf32, #tpu.memory_space<vmem>>, %arg2: memref<1x1x8xf32, #tpu.memory_space<vmem>>, %arg3: memref<32x96xf32, #tpu.memory_space<vmem>>, %arg4: memref<32x32xf32, #tpu.memory_space<vmem>>, %arg5: memref<32x128xf32, #tpu.memory_space<vmem>>, %arg6: memref<128x32xf32, #tpu.memory_space<vmem>>, %arg7: memref<2x128xf32, #tpu.memory_space<vmem>>, %arg8: memref<6x32xf32, #tpu.memory_space<vmem>>, %arg9: memref<1x8x32xf32, #tpu.memory_space<vmem>>) attributes {dimension_semantics = [#tpu.dimension_semantics<parallel>], iteration_bounds = array<i64: 2>, scalar_prefetch = 0 : i64, scratch_operands = 0 : i64, tpu.core_type = #tpu.core_type<tc>, window_params = [{transform_indices = @transform_0, window_bounds = array<i64: 1, 8, 32>}, {transform_indices = @transform_1, window_bounds = array<i64: 1, 1, 8>}, {pipeline_mode = #tpu.pipeline_mode<synchronous>, transform_indices = @transform_2, window_bounds = array<i64: 32, 96>}, {pipeline_mode = #tpu.pipeline_mode<synchronous>, transform_indices = @transform_3, window_bounds = array<i64: 32, 32>}, {pipeline_mode = #tpu.pipeline_mode<synchronous>, transform_indices = @transform_4, window_bounds = array<i64: 32, 128>}, {pipeline_mode = #tpu.pipeline_mode<synchronous>, transform_indices = @transform_5, window_bounds = array<i64: 128, 32>}, {pipeline_mode = #tpu.pipeline_mode<synchronous>, transform_indices = @transform_6, window_bounds = array<i64: 2, 128>}, {pipeline_mode = #tpu.pipeline_mode<synchronous>, transform_indices = @transform_7, window_bounds = array<i64: 6, 32>}, {transform_indices = @transform_8, window_bounds = array<i64: 1, 8, 32>}]} {
    %c0 = arith.constant 0 : index
    %c0_0 = arith.constant 0 : index
    %c0_1 = arith.constant 0 : index
    %0 = vector.load %arg1[%c0, %c0_0, %c0_1] : memref<1x8x32xf32, #tpu.memory_space<vmem>>, vector<1x8x32xf32>
    %1 = vector.shape_cast %0 : vector<1x8x32xf32> to vector<8x32xf32>
    %c0_2 = arith.constant 0 : index
    %c0_3 = arith.constant 0 : index
    %2 = vector.load %arg8[%c0_2, %c0_3] : memref<6x32xf32, #tpu.memory_space<vmem>>, vector<6x32xf32>
    %3 = vector.extract_strided_slice %2 {offsets = [0, 0], sizes = [1, 32], strides = [1, 1]} : vector<6x32xf32> to vector<1x32xf32>
    %4 = vector.extract_strided_slice %2 {offsets = [1, 0], sizes = [1, 32], strides = [1, 1]} : vector<6x32xf32> to vector<1x32xf32>
    %5 = vector.extract_strided_slice %2 {offsets = [2, 0], sizes = [1, 32], strides = [1, 1]} : vector<6x32xf32> to vector<1x32xf32>
    %6 = vector.extract_strided_slice %2 {offsets = [3, 0], sizes = [1, 32], strides = [1, 1]} : vector<6x32xf32> to vector<1x32xf32>
    %7 = vector.extract_strided_slice %2 {offsets = [4, 0], sizes = [1, 32], strides = [1, 1]} : vector<6x32xf32> to vector<1x32xf32>
    %8 = vector.extract_strided_slice %2 {offsets = [5, 0], sizes = [1, 32], strides = [1, 1]} : vector<6x32xf32> to vector<1x32xf32>
    %c0_4 = arith.constant 0 : index
    %c0_5 = arith.constant 0 : index
    %9 = vector.load %arg7[%c0_4, %c0_5] : memref<2x128xf32, #tpu.memory_space<vmem>>, vector<2x128xf32>
    %10 = vector.extract_strided_slice %9 {offsets = [0, 0], sizes = [1, 96], strides = [1, 1]} : vector<2x128xf32> to vector<1x96xf32>
    %11 = vector.extract_strided_slice %9 {offsets = [1, 0], sizes = [1, 128], strides = [1, 1]} : vector<2x128xf32> to vector<1x128xf32>
    %c0_6 = arith.constant 0 : index
    %c0_7 = arith.constant 0 : index
    %c0_8 = arith.constant 0 : index
    %12 = vector.load %arg2[%c0_6, %c0_7, %c0_8] : memref<1x1x8xf32, #tpu.memory_space<vmem>>, vector<1x1x8xf32>
    %13 = vector.shape_cast %12 : vector<1x1x8xf32> to vector<1x8xf32>
    %cst = arith.constant dense<0.000000e+00> : vector<8xf32>
    %14 = vector.multi_reduction <add>, %1, %cst [1] : vector<8x32xf32> to vector<8xf32>
    %15 = vector.shape_cast %14 : vector<8xf32> to vector<8x1xf32>
    %cst_9 = arith.constant 3.200000e+01 : f32
    %16 = vector.broadcast %cst_9 : f32 to vector<8x1xf32>
    %17 = arith.divf %15, %16 : vector<8x1xf32>
    %18 = vector.broadcast %17 : vector<8x1xf32> to vector<8x32xf32>
    %19 = arith.subf %1, %18 : vector<8x32xf32>
    %20 = arith.mulf %19, %19 : vector<8x32xf32>
    %cst_10 = arith.constant dense<0.000000e+00> : vector<8xf32>
    %21 = vector.multi_reduction <add>, %20, %cst_10 [1] : vector<8x32xf32> to vector<8xf32>
    %22 = vector.shape_cast %21 : vector<8xf32> to vector<8x1xf32>
    %cst_11 = arith.constant 3.200000e+01 : f32
    %23 = vector.broadcast %cst_11 : f32 to vector<8x1xf32>
    %24 = arith.divf %22, %23 : vector<8x1xf32>
    %25 = vector.broadcast %17 : vector<8x1xf32> to vector<8x32xf32>
    %26 = arith.subf %1, %25 : vector<8x32xf32>
    %cst_12 = arith.constant 9.99999974E-6 : f32
    %27 = vector.broadcast %cst_12 : f32 to vector<8x1xf32>
    %28 = arith.addf %24, %27 : vector<8x1xf32>
    %29 = math.rsqrt %28 : vector<8x1xf32>
    %30 = vector.broadcast %29 : vector<8x1xf32> to vector<8x32xf32>
    %31 = arith.mulf %26, %30 : vector<8x32xf32>
    %32 = vector.broadcast %3 : vector<1x32xf32> to vector<8x32xf32>
    %33 = arith.mulf %31, %32 : vector<8x32xf32>
    %34 = vector.broadcast %4 : vector<1x32xf32> to vector<8x32xf32>
    %35 = arith.addf %33, %34 : vector<8x32xf32>
    %36 = arith.truncf %35 : vector<8x32xf32> to vector<8x32xbf16>
    %c0_13 = arith.constant 0 : index
    %c0_14 = arith.constant 0 : index
    %37 = vector.load %arg3[%c0_13, %c0_14] : memref<32x96xf32, #tpu.memory_space<vmem>>, vector<32x96xf32>
    %38 = arith.truncf %37 : vector<32x96xf32> to vector<32x96xbf16>
    %cst_15 = arith.constant dense<0.000000e+00> : vector<8x96xf32>
    %39 = tpu.matmul %36, %38, %cst_15 {dimension_numbers = #tpu.dot_dimension_numbers<[1], [0], [0], [1], [0, 0, 1, 1], [], []>} : vector<8x32xbf16>, vector<32x96xbf16>, vector<8x96xf32> -> vector<8x96xf32>
    %40 = vector.broadcast %10 : vector<1x96xf32> to vector<8x96xf32>
    %41 = arith.addf %39, %40 : vector<8x96xf32>
    %42 = vector.extract_strided_slice %41 {offsets = [0, 0], sizes = [8, 8], strides = [1, 1]} : vector<8x96xf32> to vector<8x8xf32>
    %43 = vector.extract_strided_slice %41 {offsets = [0, 32], sizes = [8, 8], strides = [1, 1]} : vector<8x96xf32> to vector<8x8xf32>
    %44 = vector.extract_strided_slice %41 {offsets = [0, 64], sizes = [8, 8], strides = [1, 1]} : vector<8x96xf32> to vector<8x8xf32>
    %45 = vector.shape_cast %42 : vector<8x8xf32> to vector<8x1x8xf32>
    %46 = vector.shape_cast %43 : vector<8x8xf32> to vector<1x8x8xf32>
    %47 = vector.broadcast %45 : vector<8x1x8xf32> to vector<8x8x8xf32>
    %48 = vector.broadcast %46 : vector<1x8x8xf32> to vector<8x8x8xf32>
    %49 = arith.mulf %47, %48 : vector<8x8x8xf32>
    %cst_16 = arith.constant dense<0.000000e+00> : vector<8x8xf32>
    %50 = vector.multi_reduction <add>, %49, %cst_16 [2] : vector<8x8x8xf32> to vector<8x8xf32>
    %cst_17 = arith.constant 0.353553385 : f32
    %51 = vector.broadcast %cst_17 : f32 to vector<8x8xf32>
    %52 = arith.mulf %50, %51 : vector<8x8xf32>
    %53 = vector.broadcast %13 : vector<1x8xf32> to vector<8x8xf32>
    %54 = arith.addf %52, %53 : vector<8x8xf32>
    %cst_18 = arith.constant dense<0xFF800000> : vector<8xf32>
    %55 = vector.multi_reduction <maximumf>, %54, %cst_18 [1] : vector<8x8xf32> to vector<8xf32>
    %56 = vector.shape_cast %55 : vector<8xf32> to vector<8x1xf32>
    %57 = vector.broadcast %56 : vector<8x1xf32> to vector<8x8xf32>
    %58 = arith.subf %54, %57 : vector<8x8xf32>
    %59 = math.exp %58 : vector<8x8xf32>
    %cst_19 = arith.constant dense<0.000000e+00> : vector<8xf32>
    %60 = vector.multi_reduction <add>, %59, %cst_19 [1] : vector<8x8xf32> to vector<8xf32>
    %61 = vector.shape_cast %60 : vector<8xf32> to vector<8x1xf32>
    %62 = tpu.reciprocal %61 {approx = true} : vector<8x1xf32> -> vector<8x1xf32>
    %63 = vector.broadcast %62 : vector<8x1xf32> to vector<8x8xf32>
    %64 = arith.mulf %59, %63 : vector<8x8xf32>
    %65 = vector.shape_cast %64 : vector<8x8xf32> to vector<8x8x1xf32>
    %66 = vector.shape_cast %44 : vector<8x8xf32> to vector<1x8x8xf32>
    %67 = vector.broadcast %65 : vector<8x8x1xf32> to vector<8x8x8xf32>
    %68 = vector.broadcast %66 : vector<1x8x8xf32> to vector<8x8x8xf32>
    %69 = arith.mulf %67, %68 : vector<8x8x8xf32>
    %cst_20 = arith.constant dense<0.000000e+00> : vector<8x8xf32>
    %70 = vector.multi_reduction <add>, %69, %cst_20 [1] : vector<8x8x8xf32> to vector<8x8xf32>
    %71 = vector.extract_strided_slice %41 {offsets = [0, 8], sizes = [8, 8], strides = [1, 1]} : vector<8x96xf32> to vector<8x8xf32>
    %72 = vector.extract_strided_slice %41 {offsets = [0, 40], sizes = [8, 8], strides = [1, 1]} : vector<8x96xf32> to vector<8x8xf32>
    %73 = vector.extract_strided_slice %41 {offsets = [0, 72], sizes = [8, 8], strides = [1, 1]} : vector<8x96xf32> to vector<8x8xf32>
    %74 = vector.shape_cast %71 : vector<8x8xf32> to vector<8x1x8xf32>
    %75 = vector.shape_cast %72 : vector<8x8xf32> to vector<1x8x8xf32>
    %76 = vector.broadcast %74 : vector<8x1x8xf32> to vector<8x8x8xf32>
    %77 = vector.broadcast %75 : vector<1x8x8xf32> to vector<8x8x8xf32>
    %78 = arith.mulf %76, %77 : vector<8x8x8xf32>
    %cst_21 = arith.constant dense<0.000000e+00> : vector<8x8xf32>
    %79 = vector.multi_reduction <add>, %78, %cst_21 [2] : vector<8x8x8xf32> to vector<8x8xf32>
    %cst_22 = arith.constant 0.353553385 : f32
    %80 = vector.broadcast %cst_22 : f32 to vector<8x8xf32>
    %81 = arith.mulf %79, %80 : vector<8x8xf32>
    %82 = vector.broadcast %13 : vector<1x8xf32> to vector<8x8xf32>
    %83 = arith.addf %81, %82 : vector<8x8xf32>
    %cst_23 = arith.constant dense<0xFF800000> : vector<8xf32>
    %84 = vector.multi_reduction <maximumf>, %83, %cst_23 [1] : vector<8x8xf32> to vector<8xf32>
    %85 = vector.shape_cast %84 : vector<8xf32> to vector<8x1xf32>
    %86 = vector.broadcast %85 : vector<8x1xf32> to vector<8x8xf32>
    %87 = arith.subf %83, %86 : vector<8x8xf32>
    %88 = math.exp %87 : vector<8x8xf32>
    %cst_24 = arith.constant dense<0.000000e+00> : vector<8xf32>
    %89 = vector.multi_reduction <add>, %88, %cst_24 [1] : vector<8x8xf32> to vector<8xf32>
    %90 = vector.shape_cast %89 : vector<8xf32> to vector<8x1xf32>
    %91 = tpu.reciprocal %90 {approx = true} : vector<8x1xf32> -> vector<8x1xf32>
    %92 = vector.broadcast %91 : vector<8x1xf32> to vector<8x8xf32>
    %93 = arith.mulf %88, %92 : vector<8x8xf32>
    %94 = vector.shape_cast %93 : vector<8x8xf32> to vector<8x8x1xf32>
    %95 = vector.shape_cast %73 : vector<8x8xf32> to vector<1x8x8xf32>
    %96 = vector.broadcast %94 : vector<8x8x1xf32> to vector<8x8x8xf32>
    %97 = vector.broadcast %95 : vector<1x8x8xf32> to vector<8x8x8xf32>
    %98 = arith.mulf %96, %97 : vector<8x8x8xf32>
    %cst_25 = arith.constant dense<0.000000e+00> : vector<8x8xf32>
    %99 = vector.multi_reduction <add>, %98, %cst_25 [1] : vector<8x8x8xf32> to vector<8x8xf32>
    %100 = vector.extract_strided_slice %41 {offsets = [0, 16], sizes = [8, 8], strides = [1, 1]} : vector<8x96xf32> to vector<8x8xf32>
    %101 = vector.extract_strided_slice %41 {offsets = [0, 48], sizes = [8, 8], strides = [1, 1]} : vector<8x96xf32> to vector<8x8xf32>
    %102 = vector.extract_strided_slice %41 {offsets = [0, 80], sizes = [8, 8], strides = [1, 1]} : vector<8x96xf32> to vector<8x8xf32>
    %103 = vector.shape_cast %100 : vector<8x8xf32> to vector<8x1x8xf32>
    %104 = vector.shape_cast %101 : vector<8x8xf32> to vector<1x8x8xf32>
    %105 = vector.broadcast %103 : vector<8x1x8xf32> to vector<8x8x8xf32>
    %106 = vector.broadcast %104 : vector<1x8x8xf32> to vector<8x8x8xf32>
    %107 = arith.mulf %105, %106 : vector<8x8x8xf32>
    %cst_26 = arith.constant dense<0.000000e+00> : vector<8x8xf32>
    %108 = vector.multi_reduction <add>, %107, %cst_26 [2] : vector<8x8x8xf32> to vector<8x8xf32>
    %cst_27 = arith.constant 0.353553385 : f32
    %109 = vector.broadcast %cst_27 : f32 to vector<8x8xf32>
    %110 = arith.mulf %108, %109 : vector<8x8xf32>
    %111 = vector.broadcast %13 : vector<1x8xf32> to vector<8x8xf32>
    %112 = arith.addf %110, %111 : vector<8x8xf32>
    %cst_28 = arith.constant dense<0xFF800000> : vector<8xf32>
    %113 = vector.multi_reduction <maximumf>, %112, %cst_28 [1] : vector<8x8xf32> to vector<8xf32>
    %114 = vector.shape_cast %113 : vector<8xf32> to vector<8x1xf32>
    %115 = vector.broadcast %114 : vector<8x1xf32> to vector<8x8xf32>
    %116 = arith.subf %112, %115 : vector<8x8xf32>
    %117 = math.exp %116 : vector<8x8xf32>
    %cst_29 = arith.constant dense<0.000000e+00> : vector<8xf32>
    %118 = vector.multi_reduction <add>, %117, %cst_29 [1] : vector<8x8xf32> to vector<8xf32>
    %119 = vector.shape_cast %118 : vector<8xf32> to vector<8x1xf32>
    %120 = tpu.reciprocal %119 {approx = true} : vector<8x1xf32> -> vector<8x1xf32>
    %121 = vector.broadcast %120 : vector<8x1xf32> to vector<8x8xf32>
    %122 = arith.mulf %117, %121 : vector<8x8xf32>
    %123 = vector.shape_cast %122 : vector<8x8xf32> to vector<8x8x1xf32>
    %124 = vector.shape_cast %102 : vector<8x8xf32> to vector<1x8x8xf32>
    %125 = vector.broadcast %123 : vector<8x8x1xf32> to vector<8x8x8xf32>
    %126 = vector.broadcast %124 : vector<1x8x8xf32> to vector<8x8x8xf32>
    %127 = arith.mulf %125, %126 : vector<8x8x8xf32>
    %cst_30 = arith.constant dense<0.000000e+00> : vector<8x8xf32>
    %128 = vector.multi_reduction <add>, %127, %cst_30 [1] : vector<8x8x8xf32> to vector<8x8xf32>
    %129 = vector.extract_strided_slice %41 {offsets = [0, 24], sizes = [8, 8], strides = [1, 1]} : vector<8x96xf32> to vector<8x8xf32>
    %130 = vector.extract_strided_slice %41 {offsets = [0, 56], sizes = [8, 8], strides = [1, 1]} : vector<8x96xf32> to vector<8x8xf32>
    %131 = vector.extract_strided_slice %41 {offsets = [0, 88], sizes = [8, 8], strides = [1, 1]} : vector<8x96xf32> to vector<8x8xf32>
    %132 = vector.shape_cast %129 : vector<8x8xf32> to vector<8x1x8xf32>
    %133 = vector.shape_cast %130 : vector<8x8xf32> to vector<1x8x8xf32>
    %134 = vector.broadcast %132 : vector<8x1x8xf32> to vector<8x8x8xf32>
    %135 = vector.broadcast %133 : vector<1x8x8xf32> to vector<8x8x8xf32>
    %136 = arith.mulf %134, %135 : vector<8x8x8xf32>
    %cst_31 = arith.constant dense<0.000000e+00> : vector<8x8xf32>
    %137 = vector.multi_reduction <add>, %136, %cst_31 [2] : vector<8x8x8xf32> to vector<8x8xf32>
    %cst_32 = arith.constant 0.353553385 : f32
    %138 = vector.broadcast %cst_32 : f32 to vector<8x8xf32>
    %139 = arith.mulf %137, %138 : vector<8x8xf32>
    %140 = vector.broadcast %13 : vector<1x8xf32> to vector<8x8xf32>
    %141 = arith.addf %139, %140 : vector<8x8xf32>
    %cst_33 = arith.constant dense<0xFF800000> : vector<8xf32>
    %142 = vector.multi_reduction <maximumf>, %141, %cst_33 [1] : vector<8x8xf32> to vector<8xf32>
    %143 = vector.shape_cast %142 : vector<8xf32> to vector<8x1xf32>
    %144 = vector.broadcast %143 : vector<8x1xf32> to vector<8x8xf32>
    %145 = arith.subf %141, %144 : vector<8x8xf32>
    %146 = math.exp %145 : vector<8x8xf32>
    %cst_34 = arith.constant dense<0.000000e+00> : vector<8xf32>
    %147 = vector.multi_reduction <add>, %146, %cst_34 [1] : vector<8x8xf32> to vector<8xf32>
    %148 = vector.shape_cast %147 : vector<8xf32> to vector<8x1xf32>
    %149 = tpu.reciprocal %148 {approx = true} : vector<8x1xf32> -> vector<8x1xf32>
    %150 = vector.broadcast %149 : vector<8x1xf32> to vector<8x8xf32>
    %151 = arith.mulf %146, %150 : vector<8x8xf32>
    %152 = vector.shape_cast %151 : vector<8x8xf32> to vector<8x8x1xf32>
    %153 = vector.shape_cast %131 : vector<8x8xf32> to vector<1x8x8xf32>
    %154 = vector.broadcast %152 : vector<8x8x1xf32> to vector<8x8x8xf32>
    %155 = vector.broadcast %153 : vector<1x8x8xf32> to vector<8x8x8xf32>
    %156 = arith.mulf %154, %155 : vector<8x8x8xf32>
    %cst_35 = arith.constant dense<0.000000e+00> : vector<8x8xf32>
    %157 = vector.multi_reduction <add>, %156, %cst_35 [1] : vector<8x8x8xf32> to vector<8x8xf32>
    %158 = tpu.concatenate %70, %99, %128, %157 in 1 : vector<8x8xf32>, vector<8x8xf32>, vector<8x8xf32>, vector<8x8xf32> -> vector<8x32xf32>
    %159 = arith.truncf %158 : vector<8x32xf32> to vector<8x32xbf16>
    %c0_36 = arith.constant 0 : index
    %c0_37 = arith.constant 0 : index
    %160 = vector.load %arg4[%c0_36, %c0_37] : memref<32x32xf32, #tpu.memory_space<vmem>>, vector<32x32xf32>
    %161 = arith.truncf %160 : vector<32x32xf32> to vector<32x32xbf16>
    %cst_38 = arith.constant dense<0.000000e+00> : vector<8x32xf32>
    %162 = tpu.matmul %159, %161, %cst_38 {dimension_numbers = #tpu.dot_dimension_numbers<[1], [0], [0], [1], [0, 0, 1, 1], [], []>} : vector<8x32xbf16>, vector<32x32xbf16>, vector<8x32xf32> -> vector<8x32xf32>
    %163 = vector.broadcast %7 : vector<1x32xf32> to vector<8x32xf32>
    %164 = arith.addf %162, %163 : vector<8x32xf32>
    %165 = arith.addf %1, %164 : vector<8x32xf32>
    %cst_39 = arith.constant dense<0.000000e+00> : vector<8xf32>
    %166 = vector.multi_reduction <add>, %165, %cst_39 [1] : vector<8x32xf32> to vector<8xf32>
    %167 = vector.shape_cast %166 : vector<8xf32> to vector<8x1xf32>
    %cst_40 = arith.constant 3.200000e+01 : f32
    %168 = vector.broadcast %cst_40 : f32 to vector<8x1xf32>
    %169 = arith.divf %167, %168 : vector<8x1xf32>
    %170 = vector.broadcast %169 : vector<8x1xf32> to vector<8x32xf32>
    %171 = arith.subf %165, %170 : vector<8x32xf32>
    %172 = arith.mulf %171, %171 : vector<8x32xf32>
    %cst_41 = arith.constant dense<0.000000e+00> : vector<8xf32>
    %173 = vector.multi_reduction <add>, %172, %cst_41 [1] : vector<8x32xf32> to vector<8xf32>
    %174 = vector.shape_cast %173 : vector<8xf32> to vector<8x1xf32>
    %cst_42 = arith.constant 3.200000e+01 : f32
    %175 = vector.broadcast %cst_42 : f32 to vector<8x1xf32>
    %176 = arith.divf %174, %175 : vector<8x1xf32>
    %177 = vector.broadcast %169 : vector<8x1xf32> to vector<8x32xf32>
    %178 = arith.subf %165, %177 : vector<8x32xf32>
    %cst_43 = arith.constant 9.99999974E-6 : f32
    %179 = vector.broadcast %cst_43 : f32 to vector<8x1xf32>
    %180 = arith.addf %176, %179 : vector<8x1xf32>
    %181 = math.rsqrt %180 : vector<8x1xf32>
    %182 = vector.broadcast %181 : vector<8x1xf32> to vector<8x32xf32>
    %183 = arith.mulf %178, %182 : vector<8x32xf32>
    %184 = vector.broadcast %5 : vector<1x32xf32> to vector<8x32xf32>
    %185 = arith.mulf %183, %184 : vector<8x32xf32>
    %186 = vector.broadcast %6 : vector<1x32xf32> to vector<8x32xf32>
    %187 = arith.addf %185, %186 : vector<8x32xf32>
    %188 = arith.truncf %187 : vector<8x32xf32> to vector<8x32xbf16>
    %c0_44 = arith.constant 0 : index
    %c0_45 = arith.constant 0 : index
    %189 = vector.load %arg5[%c0_44, %c0_45] : memref<32x128xf32, #tpu.memory_space<vmem>>, vector<32x128xf32>
    %190 = arith.truncf %189 : vector<32x128xf32> to vector<32x128xbf16>
    %cst_46 = arith.constant dense<0.000000e+00> : vector<8x128xf32>
    %191 = tpu.matmul %188, %190, %cst_46 {dimension_numbers = #tpu.dot_dimension_numbers<[1], [0], [0], [1], [0, 0, 1, 1], [], []>} : vector<8x32xbf16>, vector<32x128xbf16>, vector<8x128xf32> -> vector<8x128xf32>
    %192 = vector.broadcast %11 : vector<1x128xf32> to vector<8x128xf32>
    %193 = arith.addf %191, %192 : vector<8x128xf32>
    %cst_47 = arith.constant 5.000000e-01 : f32
    %194 = vector.broadcast %cst_47 : f32 to vector<8x128xf32>
    %195 = arith.mulf %194, %193 : vector<8x128xf32>
    %cst_48 = arith.constant 0.707106769 : f32
    %196 = vector.broadcast %cst_48 : f32 to vector<8x128xf32>
    %197 = arith.mulf %193, %196 : vector<8x128xf32>
    %cst_49 = arith.constant 0.000000e+00 : f32
    %198 = vector.broadcast %cst_49 : f32 to vector<8x128xf32>
    %199 = arith.cmpf oge, %197, %198 : vector<8x128xf32>
    %cst_50 = arith.constant 1.000000e+00 : f32
    %cst_51 = arith.constant -1.000000e+00 : f32
    %200 = vector.broadcast %cst_50 : f32 to vector<8x128xf32>
    %201 = vector.broadcast %cst_51 : f32 to vector<8x128xf32>
    %202 = arith.select %199, %200, %201 : vector<8x128xi1>, vector<8x128xf32>
    %203 = math.absf %197 : vector<8x128xf32>
    %cst_52 = arith.constant 0.327591091 : f32
    %204 = vector.broadcast %cst_52 : f32 to vector<8x128xf32>
    %205 = arith.mulf %204, %203 : vector<8x128xf32>
    %cst_53 = arith.constant 1.000000e+00 : f32
    %206 = vector.broadcast %cst_53 : f32 to vector<8x128xf32>
    %207 = arith.addf %206, %205 : vector<8x128xf32>
    %cst_54 = arith.constant 1.000000e+00 : f32
    %208 = vector.broadcast %cst_54 : f32 to vector<8x128xf32>
    %209 = arith.divf %208, %207 : vector<8x128xf32>
    %cst_55 = arith.constant 1.06140542 : f32
    %210 = vector.broadcast %cst_55 : f32 to vector<8x128xf32>
    %211 = arith.mulf %210, %209 : vector<8x128xf32>
    %cst_56 = arith.constant -1.45315206 : f32
    %212 = vector.broadcast %cst_56 : f32 to vector<8x128xf32>
    %213 = arith.addf %211, %212 : vector<8x128xf32>
    %214 = arith.mulf %213, %209 : vector<8x128xf32>
    %cst_57 = arith.constant 1.42141378 : f32
    %215 = vector.broadcast %cst_57 : f32 to vector<8x128xf32>
    %216 = arith.addf %214, %215 : vector<8x128xf32>
    %217 = arith.mulf %216, %209 : vector<8x128xf32>
    %cst_58 = arith.constant -0.284496725 : f32
    %218 = vector.broadcast %cst_58 : f32 to vector<8x128xf32>
    %219 = arith.addf %217, %218 : vector<8x128xf32>
    %220 = arith.mulf %219, %209 : vector<8x128xf32>
    %cst_59 = arith.constant 0.254829586 : f32
    %221 = vector.broadcast %cst_59 : f32 to vector<8x128xf32>
    %222 = arith.addf %220, %221 : vector<8x128xf32>
    %223 = arith.mulf %222, %209 : vector<8x128xf32>
    %cst_60 = arith.constant 0.000000e+00 : f32
    %224 = vector.broadcast %cst_60 : f32 to vector<8x128xf32>
    %225 = arith.subf %224, %203 : vector<8x128xf32>
    %226 = arith.mulf %225, %203 : vector<8x128xf32>
    %227 = math.exp %226 : vector<8x128xf32>
    %228 = arith.mulf %223, %227 : vector<8x128xf32>
    %cst_61 = arith.constant 1.000000e+00 : f32
    %229 = vector.broadcast %cst_61 : f32 to vector<8x128xf32>
    %230 = arith.subf %229, %228 : vector<8x128xf32>
    %231 = arith.mulf %202, %230 : vector<8x128xf32>
    %cst_62 = arith.constant 1.000000e+00 : f32
    %232 = vector.broadcast %cst_62 : f32 to vector<8x128xf32>
    %233 = arith.addf %232, %231 : vector<8x128xf32>
    %234 = arith.mulf %195, %233 : vector<8x128xf32>
    %235 = arith.truncf %234 : vector<8x128xf32> to vector<8x128xbf16>
    %c0_63 = arith.constant 0 : index
    %c0_64 = arith.constant 0 : index
    %236 = vector.load %arg6[%c0_63, %c0_64] : memref<128x32xf32, #tpu.memory_space<vmem>>, vector<128x32xf32>
    %237 = arith.truncf %236 : vector<128x32xf32> to vector<128x32xbf16>
    %cst_65 = arith.constant dense<0.000000e+00> : vector<8x32xf32>
    %238 = tpu.matmul %235, %237, %cst_65 {dimension_numbers = #tpu.dot_dimension_numbers<[1], [0], [0], [1], [0, 0, 1, 1], [], []>} : vector<8x128xbf16>, vector<128x32xbf16>, vector<8x32xf32> -> vector<8x32xf32>
    %239 = vector.broadcast %8 : vector<1x32xf32> to vector<8x32xf32>
    %240 = arith.addf %238, %239 : vector<8x32xf32>
    %241 = arith.addf %165, %240 : vector<8x32xf32>
    %242 = vector.shape_cast %241 : vector<8x32xf32> to vector<1x8x32xf32>
    %c0_66 = arith.constant 0 : index
    %c0_67 = arith.constant 0 : index
    %c0_68 = arith.constant 0 : index
    %243 = vector.load %arg9[%c0_66, %c0_67, %c0_68] : memref<1x8x32xf32, #tpu.memory_space<vmem>>, vector<1x8x32xf32>
    tpu.vector_store %arg9[%c0_66, %c0_67, %c0_68], %242 {strides = array<i32>} : memref<1x8x32xf32, #tpu.memory_space<vmem>>, vector<1x8x32xf32>,
    return
  }
  func.func @transform_0(%arg0: i32) -> (i32, i32, i32) {
    %c0_i32 = arith.constant 0 : i32
    %c0_i32_0 = arith.constant 0 : i32
    %c0_i32_1 = arith.constant 0 : i32
    return %arg0, %c0_i32, %c0_i32_0 : i32, i32, i32
  }
  func.func @transform_1(%arg0: i32) -> (i32, i32, i32) {
    %c0_i32 = arith.constant 0 : i32
    %c0_i32_0 = arith.constant 0 : i32
    %c0_i32_1 = arith.constant 0 : i32
    return %arg0, %c0_i32, %c0_i32_0 : i32, i32, i32
  }
  func.func @transform_2(%arg0: i32) -> (i32, i32) {
    %c0_i32 = arith.constant 0 : i32
    %c0_i32_0 = arith.constant 0 : i32
    %c0_i32_1 = arith.constant 0 : i32
    return %c0_i32, %c0_i32_0 : i32, i32
  }
  func.func @transform_3(%arg0: i32) -> (i32, i32) {
    %c0_i32 = arith.constant 0 : i32
    %c0_i32_0 = arith.constant 0 : i32
    %c0_i32_1 = arith.constant 0 : i32
    return %c0_i32, %c0_i32_0 : i32, i32
  }
  func.func @transform_4(%arg0: i32) -> (i32, i32) {
    %c0_i32 = arith.constant 0 : i32
    %c0_i32_0 = arith.constant 0 : i32
    %c0_i32_1 = arith.constant 0 : i32
    return %c0_i32, %c0_i32_0 : i32, i32
  }
  func.func @transform_5(%arg0: i32) -> (i32, i32) {
    %c0_i32 = arith.constant 0 : i32
    %c0_i32_0 = arith.constant 0 : i32
    %c0_i32_1 = arith.constant 0 : i32
    return %c0_i32, %c0_i32_0 : i32, i32
  }
  func.func @transform_6(%arg0: i32) -> (i32, i32) {
    %c0_i32 = arith.constant 0 : i32
    %c0_i32_0 = arith.constant 0 : i32
    %c0_i32_1 = arith.constant 0 : i32
    return %c0_i32, %c0_i32_0 : i32, i32
  }
  func.func @transform_7(%arg0: i32) -> (i32, i32) {
    %c0_i32 = arith.constant 0 : i32
    %c0_i32_0 = arith.constant 0 : i32
    %c0_i32_1 = arith.constant 0 : i32
    return %c0_i32, %c0_i32_0 : i32, i32
  }
  func.func @transform_8(%arg0: i32) -> (i32, i32, i32) {
    %c0_i32 = arith.constant 0 : i32
    %c0_i32_0 = arith.constant 0 : i32
    %c0_i32_1 = arith.constant 0 : i32
    return %arg0, %c0_i32, %c0_i32_0 : i32, i32, i32
  }
}

</mosaic_0001>

<bundles_post_ra>
// kernel: tpu_custom_call.1
= control target key start
LH: loop header
LB: loop body
LE: loop exit
PB: predicated region body
PF: predicated region fallthrough
CT: control target
= control target key end

     0   :  { %13 = vsyncpa [#allocation3], 0  ;;  %s3961_s0 = inlined_call_operand.vmem [shape: f32[2,8,32], index: 0, kind: input, shape index: {}]   ;;  %s3962_s1 = inlined_call_operand.vmem [shape: f32[2,1,8], index: 1, kind: input, shape index: {}]   ;;  %s3963_s2 = inlined_call_operand.vmem [shape: f32[32,96], index: 2, kind: input, shape index: {}]   ;;  %s3964_s3 = inlined_call_operand.vmem [shape: f32[32,32], index: 3, kind: input, shape index: {}]   ;;  %s3965_s4 = inlined_call_operand.vmem [shape: f32[32,128], index: 4, kind: input, shape index: {}]   ;;  %s3966_s5 = inlined_call_operand.vmem [shape: f32[128,32], index: 5, kind: input, shape index: {}]   ;;  %s3967_s6 = inlined_call_operand.vmem [shape: f32[2,128], index: 6, kind: input, shape index: {}]   ;;  %s3968_s7 = inlined_call_operand.vmem [shape: f32[6,32], index: 7, kind: input, shape index: {}]   ;;  %s3969_s8 = inlined_call_operand.hbm [shape: f32[2,8,32], index: 8, kind: output, shape index: {}]  }
   0x1   :  { %15 = vsyncpa [#allocation3 + $0x1], 0  ;;  %s2968_s27 = smov 0   ;;  %s2970_s28 = smov 0  }
   0x2   :  { %s2972_s29 = smov 0   ;;  %s2974_s30 = smov 0  }
   0x3 LB: > { %s2989_s9 = sadd.s32 4294967295, %s2910_s30   ;;  %s2628_s10 = sadd.s32 4294967294, %s2910_s30   ;;  %s2910_s30 = sphi %s2974_s30, %s4000_s30   ;;  %s2906_s29 = sphi %s2972_s29, %s3999_s29   ;;  %s2902_s28 = sphi %s2970_s28, %s3998_s28   ;;  %s2898_s27 = sphi %s2968_s27, %s3997_s27  }
   0x4   : > { %s2993_s11 = sadd.s32 1, %s2910_s30   ;;  %s206_s12 = sadd.s32 1, %s2906_s29 }
   0x5   : > { %s203_s13 = ssub.s32 %s2910_s30, %s2993_s11  ;;  %p216_p0 = scmp.ne.s32.totalorder %s2906_s29, %s2902_s28 }
   0x6   : > { %p204_p1 = scmp.eq.s32.totalorder %s203_s13, 0  ;;  %p217_p2 = scmp.eq.s32.totalorder %s2989_s9, 1 }
   0x7   : > { %p222_p3 = scmp.ne.s32.totalorder %s2902_s28, %s2898_s27  ;;  %p223_p4 = scmp.eq.s32.totalorder %s2628_s10, 1 }
   0x8   : > { %s3004_s14 = scalar_select %p204_p1, %s2906_s29, %s206_s12  }
   0x9   : > { %p3006_p5 = por %p217_p2, %p216_p0  ;;  %p3010_p6 = por %p223_p4, %p222_p3 }
   0xa   : > { %p2631_p7 = scmp.ge.s32.totalorder %s2910_s30, 1  ;;  %p272_p8 = scmp.lt.s32.totalorder %s2910_s30, 3 }
   0xc   : > { %p273_p9 = pnand %p2631_p7, %p272_p8 }
   0xe   : > { %276 = sbr.rel (%p273_p9) target bundleno = 2945 (0xb81), region = 52 }
  0x15   : > { %p308_p10 = scmp.lt.s32.totalorder %s2989_s9, 1  ;;  %vm320_vm0 = vcmask 261120   ;;  %v346_v7 = vld [vmem:[%s3963_s2] sm:$0xff]  ;;  %v347_v8 = vld [vmem:[%s3963_s2 + $0x8] sm:$0xff]  ;;  %v348_v9 = vld [vmem:[%s3963_s2 + $0x10] sm:$0xff]  ;;  %v3970_v10 = vmov 0.0   ;;  %v335_v17 = vlaneseq }
  0x16   : > { %2660 = vmatprep.subr.bf16.mxu0 %v3970_v10  ;;  %v350_v11 = vpack.c.bf16 %v347_v8, %v346_v7  ;;  %v349_v12 = vld [vmem:[%s3963_s2 + $0x18] sm:$0xff]  ;;  %vm2913_vm1 = vmmov 0   ;;  %2684 = vmatprep.subr.bf16.mxu1 %v3970_v10  ;;  %v317_v21 = vld [vmem:[%s3968_s7] sm:$0x3f]  ;;  %s2914_s25 = smov 96   ;;  %s2916_s26 = smov 120  }
  0x17   : > { %s3018_s17 = scalar_select %p308_p10, %s2989_s9, 1  ;;  %2664 = vmatprep.mubr.msk.bf16.mxu0 %vm2913_vm1, %v3970_v10  ;;  %2700 = vmatprep.mubr.msk.bf16.mxu1 %vm2913_vm1, %v3970_v10  ;;  %v351_v13 = vpack.c.bf16 %v349_v12, %v348_v9  ;;  %v3054_v19 = vshrl.u32 %v335_v17, 7  ;;  %v318_v30 = vld [vmem:[%s3967_s6] sm:$0x3]  ;;  %v2915_v37 = vmov 1966171168  }
  0x18   : > { %2661 = vmatpush3.bf16.msra.mxu0 %v350_v11  ;;  %v402_v38 = vunpack.c.l.s4 %v2915_v37  ;;  %s2917_s10 = smov 104   ;;  %s2918_s12 = smov 112   ;;  %vm500_vm2 = vcmask 64512   ;;  %vm616_vm3 = vcmask 1041409   ;;  %vm618_vm4 = vcmask 1042434  }
  0x19   : > { %s2633_s18 = sshll.u32 %s3018_s17, 3  ;;  %2662 = vmatprep.subr.bf16.mxu0 %v3970_v10  ;;  %s314_s20 = scalar_lea.vmem %s3962_s1, %s3018_s17  ;;  %v3057_v20 = vsub.s32 0, %v3054_v19  ;;  %v3063_v22 = vsub.s32 1, %v3054_v19  ;;  %vm620_vm5 = vcmask 1043459   ;;  %vm622_vm6 = vcmask 1044484  }
  0x1a   : > { %s3024_s21 = scalar_lea.vmem %s3961_s0, %s2633_s18  ;;  %v2635_v14 = vld [vmem:[%s314_s20] ss:$0 sm:$0xff]  ;;  %v403_v39 = vunpack.c.0.s8 %v402_v38  ;;  %vm624_vm7 = vcmask 1045509   ;;  %vm626_vm8 = vcmask 1046534   ;;  %vm628_vm9 = vcmask 1047559   ;;  %s2920_s22 = smov 64  }
  0x1b   : > { %v316_v0 = vld [vmem:[%s3024_s21] sm:$0xff]  ;;  %539 = vbcast.lane.b32.xlu1 %v2635_v14, 256  ;;  %v338_v23 = vrot.slane %v317_v21, %v3057_v20  ;;  %v343_v26 = vrot.slane %v317_v21, %v3063_v22  ;;  %v355_v31 = vrot.slane %v318_v30, %v3057_v20  ;;  %v2919_v14 = vmov 0   ;;  %s305_s18 = sand.u32 1, %s2902_s28   ;;  %s2639_s20 = sshll.u32 %s2989_s9, 7 }
  0x1c   : > { %v321_v1 = vsel %vm320_vm0, %v316_v0, 0.0  ;;  %2663 = vmatpush3.bf16.msra.mxu0 %v351_v13  ;;  %v406_v40 = vsub.s32 %v403_v39, %v3054_v19  ;;  %2753 = vset.pattern.permute.xlu0 %v2919_v14  ;;  %vm872_vm10 = vcmask 589312   ;;  %vm1748_vm11 = vcmask 720512   ;;  %s2632_s19 = sshll.u32 %s305_s18, 3  ;;  %s2547_s9 = scalar_lea.sflag [#allocation3], %s305_s18 }
  0x1d   : > { %322 = vadd.xlane.f32.xlu0 %v321_v1  ;;  %2668 = vmatprep.subr.bf16.mxu0 %v3970_v10  ;;  %vm1314_vm12 = vcmask 654912   ;;  %vm2182_vm13 = vcmask 786112   ;;  %vm2312_vm14 = vcmask 130048   ;;  %vm2314_vm15 = vcmask 195584  }
  0x1e   : > { %2754 = vset.pattern.permute.xlu1 %v2919_v14 }
  0x8d   : > { %v3079_v43 = vpop.permute.xlu1 %539 }
  0xaa   : > { %v323_v2 = vpop.xlane.xlu0 %322 }
  0xab   : > { %v325_v3 = vmul.f32 0.03125, %v323_v2 }
  0xad   : > { %v326_v4 = vsub.f32 %v316_v0, %v325_v3 }
  0xaf   : > { %v327_v5 = vmul.f32 %v326_v4, %v326_v4 }
  0xb1   : > { %v328_v6 = vsel %vm320_vm0, %v327_v5, 0.0 }
  0xb2   : > { %329 = vadd.xlane.f32.xlu0 %v328_v6 }
 0x13f   : > { %v330_v15 = vpop.xlane.xlu0 %329 }
 0x140   : > { %v331_v16 = vmul.f32 0.03125, %v330_v15 }
 0x142   : > { %v332_v18 = vadd.f32 1e-05, %v331_v16 }
 0x144   : > { %2765 = vrsqrt.f32 %v332_v18 }
 0x14e   : > { %v2766_v24 = vpop.eup %2765 }
 0x14f   : > { %v334_v25 = vmul.f32 %v2766_v24, %v326_v4 }
 0x151   : > { %v339_v27 = vmul.f32 %v338_v23, %v334_v25 }
 0x153   : > { %v344_v28 = vadd.f32 %v343_v26, %v339_v27 }
 0x155   : > { %v345_v29 = vpack.c.bf16 %v344_v28, %v344_v28 }
 0x157   : > { %2665 = vmatmul.mubr.msk.bf16.vlgmr.msra.gmra.mrb[0].mxu0 %vm320_vm0, %v345_v29 }
 0x158   : > { %2672 = vmatprep.mubr.msk.bf16.mxu0 %vm2913_vm1, %v3970_v10 }
 0x22a   : > { %v393_v32 = vpop.f32.mrb[0].mxu0 }
 0x22b   : > { %v3074_v33 = vadd.f32 %v393_v32, %v355_v31  ;;  %v2666_v34 = vpop.f32.mrb[1].mxu0 }
 0x22c   : > { %v396_v35 = vpop.f32.mrb[2].mxu0 }
 0x22d   : > { %3982 = vst [vmem:[#allocation5_spill] sm:$0xff] %v3074_v33  ;;  %489 = vrot.lane.b32.xlu1 %v3074_v33, %s2914_s25  ;;  %v2667_v36 = vpop.f32.mrb[3].mxu0  ;;  %v407_v41 = vrot.slane %v3074_v33, %v406_v40  ;;  %v400_v46 = vcombine.high %v3074_v33, %v3074_v33  ;;  %s3918_s25 = scalar_lea.hbm %s3969_s8, %s2639_s20 }
 0x22f   : > { %v415_v42 = vcombine.high %v407_v41, %v407_v41  ;;  %v423_v44 = vrot.slane %v407_v41, %v406_v40  ;;  %v414_v50 = vrot.slane %v400_v46, %v406_v40 }
 0x231   : > { %v437_v45 = vrot.slane %v415_v42, %v406_v40  ;;  %v452_v47 = vrot.slane %v423_v44, %v3057_v20  ;;  %v445_v49 = vcombine.high %v423_v44, %v423_v44  ;;  %v416_v56 = vcombine.high %v414_v50, %v414_v50 }
 0x232   : > { %v430_v1 = vrot.slane %v414_v50, %v406_v40 }
 0x233   : > { %v456_v48 = vrot.slane %v437_v45, %v3057_v20  ;;  %v460_v54 = vrot.slane %v445_v49, %v3057_v20  ;;  %v447_v55 = vcombine.high %v437_v45, %v437_v45  ;;  %v444_v59 = vrot.slane %v416_v56, %v406_v40 }
 0x234   : > { %v468_v3 = vrot.slane %v430_v1, %v3057_v20  ;;  %v446_v4 = vcombine.high %v430_v1, %v430_v1 }
 0x235   : > { %v464_v58 = vrot.slane %v447_v55, %v3057_v20  ;;  %v472_v61 = vrot.slane %v444_v59, %v3057_v20  ;;  %v448_v63 = vcombine.high %v444_v59, %v444_v59 }
 0x236   : > { %v476_v6 = vrot.slane %v446_v4, %v3057_v20 }
 0x237   : > { %v480_v0 = vrot.slane %v448_v63, %v3057_v20 }
 0x29f   : > { %v490_v51 = vpop.permute.xlu1 %489 }
 0x2a0   : > { %v492_v52 = vmul.f32 %v490_v51, %v452_v47  ;;  %v493_v53 = vmul.f32 %v490_v51, %v456_v48  ;;  %v494_v57 = vmul.f32 %v490_v51, %v460_v54  ;;  %v495_v60 = vmul.f32 %v490_v51, %v464_v58 }
 0x2a1   : > { %v497_v62 = vmul.f32 %v490_v51, %v472_v61  ;;  %v499_v2 = vmul.f32 %v490_v51, %v480_v0  ;;  %v496_v5 = vmul.f32 %v490_v51, %v468_v3  ;;  %v498_v7 = vmul.f32 %v490_v51, %v476_v6 }
 0x2a2   : > { %937 = vrot.lane.b32.xlu1 %v492_v52, %s2916_s26  ;;  %939 = vrot.lane.b32.xlu0 %v493_v53, %s2916_s26  ;;  %v501_v8 = vsel %vm500_vm2, %v492_v52, 0.0  ;;  %v504_v15 = vsel %vm500_vm2, %v493_v53, 0.0  ;;  %v507_v16 = vsel %vm500_vm2, %v494_v57, 0.0  ;;  %v510_v18 = vsel %vm500_vm2, %v495_v60, 0.0 }
 0x2a3   : > { %v513_v9 = vsel %vm500_vm2, %v496_v5, 0.0  ;;  %v516_v11 = vsel %vm500_vm2, %v497_v62, 0.0  ;;  %v519_v12 = vsel %vm500_vm2, %v498_v7, 0.0  ;;  %v522_v13 = vsel %vm500_vm2, %v499_v2, 0.0 }
 0x2a6   : > { %941 = vrot.lane.b32.xlu1 %v494_v57, %s2916_s26  ;;  %1807 = vrot.lane.b32.xlu0 %v493_v53, %s2917_s10 }
 0x2aa   : > { %1371 = vrot.lane.b32.xlu1 %v492_v52, %s2918_s12  ;;  %1377 = vrot.lane.b32.xlu0 %v495_v60, %s2918_s12 }
 0x2ae   : > { %1373 = vrot.lane.b32.xlu1 %v493_v53, %s2918_s12  ;;  %947 = vrot.lane.b32.xlu0 %v497_v62, %s2916_s26 }
 0x2b2   : > { %943 = vrot.lane.b32.xlu1 %v495_v60, %s2916_s26  ;;  %1811 = vrot.lane.b32.xlu0 %v495_v60, %s2917_s10 }
 0x2b6   : > { %1375 = vrot.lane.b32.xlu1 %v494_v57, %s2918_s12  ;;  %1381 = vrot.lane.b32.xlu0 %v497_v62, %s2918_s12 }
 0x2ba   : > { %1805 = vrot.lane.b32.xlu1 %v492_v52, %s2917_s10  ;;  %951 = vrot.lane.b32.xlu0 %v499_v2, %s2916_s26 }
 0x2be   : > { %945 = vrot.lane.b32.xlu1 %v496_v5, %s2916_s26  ;;  %1815 = vrot.lane.b32.xlu0 %v497_v62, %s2917_s10 }
 0x2c2   : > { %1809 = vrot.lane.b32.xlu1 %v494_v57, %s2917_s10  ;;  %1817 = vrot.lane.b32.xlu0 %v498_v7, %s2917_s10 }
 0x2c6   : > { %1379 = vrot.lane.b32.xlu1 %v496_v5, %s2918_s12 }
 0x2ca   : > { %949 = vrot.lane.b32.xlu1 %v498_v7, %s2916_s26 }
 0x2ce   : > { %1813 = vrot.lane.b32.xlu1 %v496_v5, %s2917_s10 }
 0x2d2   : > { %1383 = vrot.lane.b32.xlu1 %v498_v7, %s2918_s12 }
 0x2d6   : > { %1385 = vrot.lane.b32.xlu1 %v499_v2, %s2918_s12 }
 0x2da   : > { %1819 = vrot.lane.b32.xlu1 %v499_v2, %s2917_s10  ;;  %s2922_s10 = smov [#allocation2]  }
 0x2db   : > { %s2852_s12 = sshll.u32 %s2922_s10, 4  ;;  %s2853_s12 = int_to_ptr.vmem [resolvable:$false] %s2852_s12 }
 0x2dc   : > { %s2854_s13 = scalar_lea.vmem %s2853_s12, 256 }
 0x2e1   : > { %502 = vadd.xlane.f32.xlu0 %v501_v8 }
 0x2e5   : > { %514 = vadd.xlane.f32.xlu0 %v513_v9 }
 0x2e9   : > { %517 = vadd.xlane.f32.xlu0 %v516_v11 }
 0x2ed   : > { %520 = vadd.xlane.f32.xlu0 %v519_v12 }
 0x2f1   : > { %523 = vadd.xlane.f32.xlu0 %v522_v13 }
 0x2fe   : > { %505 = vadd.xlane.f32.xlu1 %v504_v15 }
 0x302   : > { %508 = vadd.xlane.f32.xlu1 %v507_v16 }
 0x306   : > { %511 = vadd.xlane.f32.xlu1 %v510_v18 }
 0x314   : > { %v938_v21 = vpop.permute.xlu1 %937  ;;  %v940_v24 = vpop.permute.xlu0 %939 }
 0x315   : > { %v961_v23 = vsel %vm500_vm2, %v938_v21, 0.0  ;;  %v964_v26 = vsel %vm500_vm2, %v940_v24, 0.0 }
 0x316   : > { %962 = vadd.xlane.f32.xlu0 %v961_v23 }
 0x318   : > { %v942_v25 = vpop.permute.xlu1 %941  ;;  %v1808_v32 = vpop.permute.xlu0 %1807 }
 0x319   : > { %v967_v29 = vsel %vm500_vm2, %v942_v25, 0.0  ;;  %v1832_v40 = vsel %vm500_vm2, %v1808_v32, 0.0 }
 0x31a   : > { %965 = vadd.xlane.f32.xlu0 %v964_v26 }
 0x31c   : > { %v1372_v27 = vpop.permute.xlu1 %1371  ;;  %v1378_v36 = vpop.permute.xlu0 %1377 }
 0x31d   : > { %v1395_v28 = vsel %vm500_vm2, %v1372_v27, 0.0  ;;  %v1404_v46 = vsel %vm500_vm2, %v1378_v36, 0.0 }
 0x31e   : > { %1396 = vadd.xlane.f32.xlu1 %v1395_v28  ;;  %968 = vadd.xlane.f32.xlu0 %v967_v29 }
 0x320   : > { %v1374_v30 = vpop.permute.xlu1 %1373  ;;  %v948_v42 = vpop.permute.xlu0 %947 }
 0x321   : > { %v1398_v31 = vsel %vm500_vm2, %v1374_v30, 0.0  ;;  %v976_v51 = vsel %vm500_vm2, %v948_v42, 0.0 }
 0x322   : > { %1399 = vadd.xlane.f32.xlu0 %v1398_v31 }
 0x324   : > { %v944_v34 = vpop.permute.xlu1 %943  ;;  %v1812_v47 = vpop.permute.xlu0 %1811 }
 0x325   : > { %v970_v35 = vsel %vm500_vm2, %v944_v34, 0.0  ;;  %v1838_v55 = vsel %vm500_vm2, %v1812_v47, 0.0 }
 0x326   : > { %971 = vadd.xlane.f32.xlu0 %v970_v35 }
 0x328   : > { %v1376_v37 = vpop.permute.xlu1 %1375  ;;  %v1382_v53 = vpop.permute.xlu0 %1381 }
 0x329   : > { %v1401_v38 = vsel %vm500_vm2, %v1376_v37, 0.0  ;;  %v1410_v56 = vsel %vm500_vm2, %v1382_v53, 0.0 }
 0x32a   : > { %1402 = vadd.xlane.f32.xlu1 %v1401_v38 }
 0x32c   : > { %v1806_v39 = vpop.permute.xlu1 %1805  ;;  %v952_v59 = vpop.permute.xlu0 %951 }
 0x32d   : > { %v1829_v41 = vsel %vm500_vm2, %v1806_v39, 0.0  ;;  %v982_v1 = vsel %vm500_vm2, %v952_v59, 0.0 }
 0x32e   : > { %1833 = vadd.xlane.f32.xlu1 %v1832_v40  ;;  %1830 = vadd.xlane.f32.xlu0 %v1829_v41 }
 0x330   : > { %v946_v44 = vpop.permute.xlu1 %945  ;;  %v1816_v63 = vpop.permute.xlu0 %1815 }
 0x331   : > { %v973_v45 = vsel %vm500_vm2, %v946_v44, 0.0  ;;  %v1844_v4 = vsel %vm500_vm2, %v1816_v63, 0.0 }
 0x332   : > { %974 = vadd.xlane.f32.xlu1 %v973_v45  ;;  %1405 = vadd.xlane.f32.xlu0 %v1404_v46 }
 0x334   : > { %v1810_v48 = vpop.permute.xlu1 %1809  ;;  %v1818_v6 = vpop.permute.xlu0 %1817 }
 0x335   : > { %v1835_v49 = vsel %vm500_vm2, %v1810_v48, 0.0  ;;  %v1847_v7 = vsel %vm500_vm2, %v1818_v6, 0.0 }
 0x336   : > { %1836 = vadd.xlane.f32.xlu1 %v1835_v49 }
 0x338   : > { %v1380_v50 = vpop.permute.xlu1 %1379 }
 0x339   : > { %v1407_v52 = vsel %vm500_vm2, %v1380_v50, 0.0 }
 0x33a   : > { %977 = vadd.xlane.f32.xlu1 %v976_v51  ;;  %1408 = vadd.xlane.f32.xlu0 %v1407_v52 }
 0x33c   : > { %v950_v54 = vpop.permute.xlu1 %949 }
 0x33d   : > { %v979_v58 = vsel %vm500_vm2, %v950_v54, 0.0 }
 0x33e   : > { %1839 = vadd.xlane.f32.xlu1 %v1838_v55  ;;  %1411 = vadd.xlane.f32.xlu0 %v1410_v56 }
 0x340   : > { %v1814_v57 = vpop.permute.xlu1 %1813 }
 0x341   : > { %v1841_v61 = vsel %vm500_vm2, %v1814_v57, 0.0 }
 0x342   : > { %980 = vadd.xlane.f32.xlu1 %v979_v58 }
 0x344   : > { %v1384_v60 = vpop.permute.xlu1 %1383 }
 0x345   : > { %v1413_v62 = vsel %vm500_vm2, %v1384_v60, 0.0 }
 0x346   : > { %1842 = vadd.xlane.f32.xlu1 %v1841_v61  ;;  %1414 = vadd.xlane.f32.xlu0 %v1413_v62 }
 0x348   : > { %v1386_v0 = vpop.permute.xlu1 %1385 }
 0x349   : > { %v1416_v2 = vsel %vm500_vm2, %v1386_v0, 0.0 }
 0x34a   : > { %983 = vadd.xlane.f32.xlu1 %v982_v1  ;;  %1417 = vadd.xlane.f32.xlu0 %v1416_v2 }
 0x34c   : > { %v1820_v3 = vpop.permute.xlu1 %1819 }
 0x34d   : > { %v1850_v5 = vsel %vm500_vm2, %v1820_v3, 0.0 }
 0x34e   : > { %1845 = vadd.xlane.f32.xlu1 %v1844_v4  ;;  %1851 = vadd.xlane.f32.xlu0 %v1850_v5 }
 0x352   : > { %1848 = vadd.xlane.f32.xlu1 %v1847_v7 }
 0x36e   : > { %v503_v8 = vpop.xlane.xlu0 %502 }
 0x36f   : > { %v525_v9 = vmul.f32 0.35355338, %v503_v8 }
 0x371   : > { %v3140_v11 = vadd.f32 %v3079_v43, %v525_v9 }
 0x372   : > { %v515_v12 = vpop.xlane.xlu0 %514 }
 0x373   : > { %559 = vperm.xlu0 %2753, %v3140_v11   ;;  %v529_v23 = vmul.f32 0.35355338, %v515_v12 }
 0x375   : > { %v3152_v28 = vadd.f32 %v3079_v43, %v529_v23 }
 0x376   : > { %v518_v16 = vpop.xlane.xlu0 %517 }
 0x377   : > { %v530_v29 = vmul.f32 0.35355338, %v518_v16 }
 0x379   : > { %v3160_v31 = vadd.f32 %v3079_v43, %v530_v29 }
 0x37a   : > { %v521_v27 = vpop.xlane.xlu0 %520 }
 0x37b   : > { %v531_v32 = vmul.f32 0.35355338, %v521_v27 }
 0x37d   : > { %v3164_v35 = vadd.f32 %v3079_v43, %v531_v32 }
 0x37e   : > { %v524_v34 = vpop.xlane.xlu0 %523 }
 0x37f   : > { %v532_v36 = vmul.f32 0.35355338, %v524_v34 }
 0x381   : > { %v3168_v37 = vadd.f32 %v3079_v43, %v532_v36 }
 0x38b   : > { %v506_v13 = vpop.xlane.xlu1 %505 }
 0x38c   : > { %v526_v14 = vmul.f32 0.35355338, %v506_v13 }
 0x38e   : > { %v3144_v15 = vadd.f32 %v3079_v43, %v526_v14 }
 0x38f   : > { %v509_v18 = vpop.xlane.xlu1 %508 }
 0x390   : > { %v527_v21 = vmul.f32 0.35355338, %v509_v18  ;;  %562 = vperm.xlu1 %2754, %v3144_v15  }
 0x392   : > { %v3148_v24 = vadd.f32 %v3079_v43, %v527_v21 }
 0x393   : > { %v512_v25 = vpop.xlane.xlu1 %511 }
 0x394   : > { %v528_v26 = vmul.f32 0.35355338, %v512_v25  ;;  %565 = vperm.xlu1 %2754, %v3148_v24  }
 0x396   : > { %v3155_v30 = vadd.f32 %v3079_v43, %v528_v26 }
 0x398   : > { %571 = vperm.xlu1 %2754, %v3152_v28   ;;  %568 = vperm.xlu0 %2753, %v3155_v30  }
 0x39c   : > { %574 = vperm.xlu1 %2754, %v3160_v31  }
 0x3a0   : > { %577 = vperm.xlu1 %2754, %v3164_v35  }
 0x3a3   : > { %v963_v38 = vpop.xlane.xlu0 %962 }
 0x3a4   : > { %v985_v39 = vmul.f32 0.35355338, %v963_v38  ;;  %580 = vperm.xlu1 %2754, %v3168_v37  }
 0x3a6   : > { %v3172_v40 = vadd.f32 %v985_v39, %v3079_v43 }
 0x3a7   : > { %v966_v41 = vpop.xlane.xlu0 %965 }
 0x3a8   : > { %v986_v42 = vmul.f32 0.35355338, %v966_v41  ;;  %1010 = vperm.xlu1 %2754, %v3172_v40  }
 0x3aa   : > { %v3176_v44 = vadd.f32 %v986_v42, %v3079_v43 }
 0x3ab   : > { %v1397_v45 = vpop.xlane.xlu1 %1396  ;;  %v969_v46 = vpop.xlane.xlu0 %968 }
 0x3ac   : > { %v987_v47 = vmul.f32 0.35355338, %v969_v46  ;;  %1013 = vperm.xlu1 %2754, %v3176_v44   ;;  %v1419_v48 = vmul.f32 0.35355338, %v1397_v45 }
 0x3ae   : > { %v3180_v49 = vadd.f32 %v987_v47, %v3079_v43  ;;  %v3184_v51 = vadd.f32 %v1419_v48, %v3079_v43 }
 0x3af   : > { %v1400_v50 = vpop.xlane.xlu0 %1399 }
 0x3b0   : > { %1016 = vperm.xlu1 %2754, %v3180_v49   ;;  %v1420_v52 = vmul.f32 0.35355338, %v1400_v50 }
 0x3b2   : > { %v3188_v54 = vadd.f32 %v1420_v52, %v3079_v43 }
 0x3b3   : > { %v972_v53 = vpop.xlane.xlu0 %971 }
 0x3b4   : > { %1444 = vperm.xlu1 %2754, %v3184_v51   ;;  %v988_v55 = vmul.f32 0.35355338, %v972_v53 }
 0x3b6   : > { %v3192_v58 = vadd.f32 %v988_v55, %v3079_v43 }
 0x3b7   : > { %v1403_v56 = vpop.xlane.xlu1 %1402 }
 0x3b8   : > { %v1421_v57 = vmul.f32 0.35355338, %v1403_v56  ;;  %1447 = vperm.xlu1 %2754, %v3188_v54  }
 0x3ba   : > { %v3195_v59 = vadd.f32 %v1421_v57, %v3079_v43 }
 0x3bb   : > { %v1834_v60 = vpop.xlane.xlu1 %1833  ;;  %v1831_v61 = vpop.xlane.xlu0 %1830 }
 0x3bc   : > { %v1854_v62 = vmul.f32 0.35355338, %v1834_v60  ;;  %v1853_v63 = vmul.f32 0.35355338, %v1831_v61  ;;  %1450 = vperm.xlu0 %2753, %v3195_v59   ;;  %1019 = vperm.xlu1 %2754, %v3192_v58  }
 0x3be   : > { %v3200_v0 = vadd.f32 %v1854_v62, %v3079_v43  ;;  %v3203_v1 = vadd.f32 %v1853_v63, %v3079_v43 }
 0x3bf   : > { %v975_v2 = vpop.xlane.xlu1 %974  ;;  %v1406_v3 = vpop.xlane.xlu0 %1405 }
 0x3c0   : > { %v989_v4 = vmul.f32 0.35355338, %v975_v2  ;;  %v1422_v5 = vmul.f32 0.35355338, %v1406_v3  ;;  %1881 = vperm.xlu0 %2753, %v3200_v0   ;;  %1878 = vperm.xlu1 %2754, %v3203_v1  }
 0x3c2   : > { %v3208_v6 = vadd.f32 %v989_v4, %v3079_v43  ;;  %v3211_v7 = vadd.f32 %v1422_v5, %v3079_v43 }
 0x3c3   : > { %v1837_v8 = vpop.xlane.xlu1 %1836 }
 0x3c4   : > { %v1855_v9 = vmul.f32 0.35355338, %v1837_v8  ;;  %1022 = vperm.xlu0 %2753, %v3208_v6   ;;  %1453 = vperm.xlu1 %2754, %v3211_v7  }
 0x3c6   : > { %v3216_v12 = vadd.f32 %v1855_v9, %v3079_v43 }
 0x3c7   : > { %v978_v13 = vpop.xlane.xlu1 %977  ;;  %v1409_v14 = vpop.xlane.xlu0 %1408 }
 0x3c8   : > { %v990_v16 = vmul.f32 0.35355338, %v978_v13  ;;  %v1423_v18 = vmul.f32 0.35355338, %v1409_v14  ;;  %1884 = vperm.xlu0 %2753, %v3216_v12   ;;  %v583_v14 = vand.u32 127, %v335_v17 }
 0x3ca   : > { %v3220_v21 = vadd.f32 %v990_v16, %v3079_v43  ;;  %v3223_v23 = vadd.f32 %v1423_v18, %v3079_v43 }
 0x3cb   : > { %v1840_v25 = vpop.xlane.xlu1 %1839  ;;  %v1412_v26 = vpop.xlane.xlu0 %1411 }
 0x3cc   : > { %v1856_v27 = vmul.f32 0.35355338, %v1840_v25  ;;  %v1424_v29 = vmul.f32 0.35355338, %v1412_v26  ;;  %1025 = vperm.xlu0 %2753, %v3220_v21   ;;  %1456 = vperm.xlu1 %2754, %v3223_v23   ;;  %v3269_v25 = vsub.s32 %v583_v14, %v3054_v19 }
 0x3ce   : > { %v3228_v32 = vadd.f32 %v1856_v27, %v3079_v43  ;;  %v3231_v34 = vadd.f32 %v1424_v29, %v3079_v43 }
 0x3cf   : > { %v981_v36 = vpop.xlane.xlu1 %980 }
 0x3d0   : > { %v991_v38 = vmul.f32 0.35355338, %v981_v36  ;;  %1887 = vperm.xlu0 %2753, %v3228_v32   ;;  %1459 = vperm.xlu1 %2754, %v3231_v34  }
 0x3d2   : > { %v3236_v39 = vadd.f32 %v991_v38, %v3079_v43 }
 0x3d3   : > { %v1843_v41 = vpop.xlane.xlu1 %1842  ;;  %v1415_v42 = vpop.xlane.xlu0 %1414 }
 0x3d4   : > { %v1857_v45 = vmul.f32 0.35355338, %v1843_v41  ;;  %v1425_v46 = vmul.f32 0.35355338, %v1415_v42  ;;  %1028 = vperm.xlu0 %2753, %v3236_v39  }
 0x3d6   : > { %v3240_v47 = vadd.f32 %v1857_v45, %v3079_v43  ;;  %v3243_v48 = vadd.f32 %v1425_v46, %v3079_v43 }
 0x3d7   : > { %v984_v50 = vpop.xlane.xlu1 %983  ;;  %v1418_v52 = vpop.xlane.xlu0 %1417 }
 0x3d8   : > { %v992_v53 = vmul.f32 0.35355338, %v984_v50  ;;  %v1426_v55 = vmul.f32 0.35355338, %v1418_v52  ;;  %1890 = vperm.xlu0 %2753, %v3240_v47   ;;  %1462 = vperm.xlu1 %2754, %v3243_v48  }
 0x3da   : > { %v3248_v56 = vadd.f32 %v992_v53, %v3079_v43  ;;  %v3251_v57 = vadd.f32 %v1426_v55, %v3079_v43 }
 0x3db   : > { %v1846_v60 = vpop.xlane.xlu1 %1845  ;;  %v1852_v61 = vpop.xlane.xlu0 %1851 }
 0x3dc   : > { %v1858_v62 = vmul.f32 0.35355338, %v1846_v60  ;;  %v1860_v63 = vmul.f32 0.35355338, %v1852_v61  ;;  %1031 = vperm.xlu0 %2753, %v3248_v56   ;;  %1465 = vperm.xlu1 %2754, %v3251_v57  }
 0x3de   : > { %v3256_v2 = vadd.f32 %v1858_v62, %v3079_v43  ;;  %v3259_v3 = vadd.f32 %v1860_v63, %v3079_v43 }
 0x3df   : > { %v1849_v4 = vpop.xlane.xlu1 %1848 }
 0x3e0   : > { %v1859_v5 = vmul.f32 0.35355338, %v1849_v4  ;;  %1893 = vperm.xlu0 %2753, %v3256_v2   ;;  %1899 = vperm.xlu1 %2754, %v3259_v3  }
 0x3e2   : > { %v3264_v8 = vadd.f32 %v1859_v5, %v3079_v43 }
 0x3e4   : > { %3983 = vst [vmem:[#allocation6_spill] sm:$0xff] %v3264_v8  ;;  %1896 = vperm.xlu0 %2753, %v3264_v8  }
 0x3f2   : > { %v560_v16 = vpop.permute.xlu0 %559 }
 0x3f3   : > { %v587_v43 = vrot.slane %v560_v16, %v3269_v25 }
 0x40f   : > { %v563_v9 = vpop.permute.xlu1 %562 }
 0x410   : > { %v591_v27 = vrot.slane %v563_v9, %v3269_v25 }
 0x412   : > { %v617_v17 = vsel %vm616_vm3, %v591_v27, %v587_v43 }
 0x413   : > { %v566_v13 = vpop.permute.xlu1 %565 }
 0x414   : > { %v595_v29 = vrot.slane %v566_v13, %v3269_v25 }
 0x416   : > { %v619_v41 = vsel %vm618_vm4, %v595_v29, %v617_v17 }
 0x417   : > { %v572_v18 = vpop.permute.xlu1 %571  ;;  %v569_v26 = vpop.permute.xlu0 %568 }
 0x418   : > { %v599_v38 = vrot.slane %v569_v26, %v3269_v25  ;;  %v603_v42 = vrot.slane %v572_v18, %v3269_v25 }
 0x41a   : > { %v621_v46 = vsel %vm620_vm5, %v599_v38, %v619_v41 }
 0x41b   : > { %v575_v36 = vpop.permute.xlu1 %574  ;;  %v623_v55 = vsel %vm622_vm6, %v603_v42, %v621_v46 }
 0x41c   : > { %v607_v50 = vrot.slane %v575_v36, %v3269_v25 }
 0x41e   : > { %v625_v61 = vsel %vm624_vm7, %v607_v50, %v623_v55 }
 0x41f   : > { %v578_v45 = vpop.permute.xlu1 %577 }
 0x420   : > { %v611_v52 = vrot.slane %v578_v45, %v3269_v25 }
 0x422   : > { %v627_v62 = vsel %vm626_vm8, %v611_v52, %v625_v61 }
 0x423   : > { %v581_v53 = vpop.permute.xlu1 %580 }
 0x424   : > { %v615_v60 = vrot.slane %v581_v53, %v3269_v25 }
 0x426   : > { %v629_v63 = vsel %vm628_vm9, %v615_v60, %v627_v62 }
 0x427   : > { %v1011_v4 = vpop.permute.xlu1 %1010  ;;  %v631_v5 = vsel %vm500_vm2, %v629_v63, -inf }
 0x428   : > { %632 = vmax.xlane.f32.xlu0 %v631_v5  ;;  %v1036_v60 = vrot.slane %v1011_v4, %v3269_v25 }
 0x42b   : > { %v1014_v9 = vpop.permute.xlu1 %1013 }
 0x42c   : > { %v1040_v50 = vrot.slane %v1014_v9, %v3269_v25 }
 0x42f   : > { %v1017_v13 = vpop.permute.xlu1 %1016 }
 0x430   : > { %v1044_v53 = vrot.slane %v1017_v13, %v3269_v25 }
 0x433   : > { %v1445_v14 = vpop.permute.xlu1 %1444 }
 0x434   : > { %v1470_v61 = vrot.slane %v1445_v14, %v3269_v25 }
 0x437   : > { %v1448_v16 = vpop.permute.xlu1 %1447 }
 0x438   : > { %v1474_v52 = vrot.slane %v1448_v16, %v3269_v25  ;;  %v1065_v16 = vsel %vm616_vm3, %v1040_v50, %v1036_v60 }
 0x439   : > { %v1066_v14 = vsel %vm618_vm4, %v1044_v53, %v1065_v16 }
 0x43a   : > { %v1499_v13 = vsel %vm616_vm3, %v1474_v52, %v1470_v61 }
 0x43b   : > { %v1451_v18 = vpop.permute.xlu0 %1450  ;;  %v1020_v26 = vpop.permute.xlu1 %1019 }
 0x43c   : > { %v1478_v55 = vrot.slane %v1451_v18, %v3269_v25  ;;  %v1048_v62 = vrot.slane %v1020_v26, %v3269_v25 }
 0x43e   : > { %v1500_v26 = vsel %vm618_vm4, %v1478_v55, %v1499_v13 }
 0x43f   : > { %v1882_v27 = vpop.permute.xlu0 %1881  ;;  %v1879_v29 = vpop.permute.xlu1 %1878 }
 0x440   : > { %v1908_v61 = vrot.slane %v1882_v27, %v3269_v25 }
 0x443   : > { %v1023_v36 = vpop.permute.xlu0 %1022  ;;  %v1454_v38 = vpop.permute.xlu1 %1453 }
 0x444   : > { %v1482_v63 = vrot.slane %v1454_v38, %v3269_v25  ;;  %v1052_v5 = vrot.slane %v1023_v36, %v3269_v25 }
 0x446   : > { %v1501_v8 = vsel %vm620_vm5, %v1482_v63, %v1500_v26 }
 0x447   : > { %v1885_v43 = vpop.permute.xlu0 %1884 }
 0x44b   : > { %v1026_v17 = vpop.permute.xlu0 %1025  ;;  %v1457_v41 = vpop.permute.xlu1 %1456 }
 0x44c   : > { %v1486_v10 = vrot.slane %v1457_v41, %v3269_v25  ;;  %v1056_v18 = vrot.slane %v1026_v17, %v3269_v25  ;;  %v1067_v41 = vsel %vm620_vm5, %v1048_v62, %v1066_v14 }
 0x44d   : > { %v1068_v50 = vsel %vm622_vm6, %v1052_v5, %v1067_v41 }
 0x44e   : > { %v1502_v52 = vsel %vm622_vm6, %v1486_v10, %v1501_v8  ;;  %v1912_v10 = vrot.slane %v1885_v43, %v3269_v25 }
 0x44f   : > { %v1888_v42 = vpop.permute.xlu0 %1887  ;;  %v1460_v45 = vpop.permute.xlu1 %1459 }
 0x450   : > { %v1490_v4 = vrot.slane %v1460_v45, %v3269_v25  ;;  %v1069_v45 = vsel %vm624_vm7, %v1056_v18, %v1068_v50  ;;  %v1916_v16 = vrot.slane %v1888_v42, %v3269_v25 }
 0x452   : > { %v1503_v53 = vsel %vm624_vm7, %v1490_v4, %v1502_v52 }
 0x453   : > { %v1029_v46 = vpop.permute.xlu0 %1028 }
 0x454   : > { %v1060_v38 = vrot.slane %v1029_v46, %v3269_v25 }
 0x456   : > { %v1070_v63 = vsel %vm626_vm8, %v1060_v38, %v1069_v45  ;;  %v3336_v45 = vsub.s32 2, %v3054_v19 }
 0x457   : > { %v1463_v33 = vpop.permute.xlu1 %1462  ;;  %v1891_v9 = vpop.permute.xlu0 %1890 }
 0x458   : > { %v1494_v36 = vrot.slane %v1463_v33, %v3269_v25  ;;  %v1904_v33 = vrot.slane %v1879_v29, %v3269_v25  ;;  %v1920_v29 = vrot.slane %v1891_v9, %v3269_v25 }
 0x45a   : > { %v1504_v62 = vsel %vm626_vm8, %v1494_v36, %v1503_v53  ;;  %v1933_v27 = vsel %vm616_vm3, %v1908_v61, %v1904_v33  ;;  %v3339_v53 = vsub.s32 4, %v3054_v19 }
 0x45b   : > { %v1466_v60 = vpop.permute.xlu1 %1465  ;;  %v1032_v17 = vpop.permute.xlu0 %1031  ;;  %v1934_v43 = vsel %vm618_vm4, %v1912_v10, %v1933_v27 }
 0x45c   : > { %v1498_v55 = vrot.slane %v1466_v60, %v3269_v25  ;;  %v1064_v46 = vrot.slane %v1032_v17, %v3269_v25  ;;  %v1935_v38 = vsel %vm620_vm5, %v1916_v16, %v1934_v43  ;;  %v3361_v43 = vsub.s32 7, %v3054_v19 }
 0x45d   : > { %v1936_v42 = vsel %vm622_vm6, %v1920_v29, %v1935_v38 }
 0x45e   : > { %v1505_v8 = vsel %vm628_vm9, %v1498_v55, %v1504_v62  ;;  %v1071_v5 = vsel %vm628_vm9, %v1064_v46, %v1070_v63  ;;  %v3342_v55 = vsub.s32 5, %v3054_v19  ;;  %v3345_v46 = vsub.s32 3, %v3054_v19 }
 0x45f   : > { %v1894_v13 = vpop.permute.xlu0 %1893  ;;  %v1507_v18 = vsel %vm500_vm2, %v1505_v8, -inf  ;;  %v1073_v4 = vsel %vm500_vm2, %v1071_v5, -inf  ;;  %v1900_v26 = vpop.permute.xlu1 %1899  ;;  %v3352_v8 = vsub.s32 6, %v3054_v19 }
 0x460   : > { %1508 = vmax.xlane.f32.xlu0 %v1507_v18  ;;  %1074 = vmax.xlane.f32.xlu1 %v1073_v4  ;;  %v1924_v14 = vrot.slane %v1894_v13, %v3269_v25  ;;  %v1932_v50 = vrot.slane %v1900_v26, %v3269_v25 }
 0x462   : > { %v1937_v9 = vsel %vm624_vm7, %v1924_v14, %v1936_v42 }
 0x463   : > { %v1897_v36 = vpop.permute.xlu0 %1896 }
 0x464   : > { %v1928_v41 = vrot.slane %v1897_v36, %v3269_v25 }
 0x466   : > { %v1938_v52 = vsel %vm626_vm8, %v1928_v41, %v1937_v9 }
 0x467   : > { %v1939_v60 = vsel %vm628_vm9, %v1932_v50, %v1938_v52 }
 0x468   : > { %v1941_v17 = vsel %vm500_vm2, %v1939_v60, -inf }
 0x469   : > { %1942 = vmax.xlane.f32.xlu0 %v1941_v17 }
 0x4b5   : > { %v633_v33 = vpop.xlane.xlu0 %632 }
 0x4b6   : > { %v638_v61 = vrot.slane %v633_v33, %v3057_v20  ;;  %v642_v62 = vrot.slane %v633_v33, %v3063_v22  ;;  %v646_v63 = vrot.slane %v633_v33, %v3336_v45  ;;  %v654_v10 = vrot.slane %v633_v33, %v3339_v53 }
 0x4b7   : > { %v658_v5 = vrot.slane %v633_v33, %v3342_v55  ;;  %v650_v18 = vrot.slane %v633_v33, %v3345_v46  ;;  %v662_v26 = vrot.slane %v633_v33, %v3352_v8  ;;  %v666_v42 = vrot.slane %v633_v33, %v3361_v43 }
 0x4b8   : > { %v675_v16 = vsub.f32 %v3140_v11, %v638_v61  ;;  %v676_v13 = vsub.f32 %v3144_v15, %v642_v62  ;;  %v677_v4 = vsub.f32 %v3148_v24, %v646_v63  ;;  %v679_v29 = vsub.f32 %v3152_v28, %v654_v10 }
 0x4b9   : > { %v680_v38 = vsub.f32 %v3160_v31, %v658_v5  ;;  %v678_v11 = vsub.f32 %v3155_v30, %v650_v18  ;;  %v681_v24 = vsub.f32 %v3164_v35, %v662_v26  ;;  %v682_v19 = vsub.f32 %v3168_v37, %v666_v42 }
 0x4ba   : > { %v683_v27 = vmul.f32 1.442695, %v675_v16  ;;  %v685_v14 = vmul.f32 1.442695, %v676_v13  ;;  %v691_v36 = vmul.f32 1.442695, %v679_v29 }
 0x4bb   : > { %v687_v15 = vmul.f32 1.442695, %v677_v4  ;;  %v693_v28 = vmul.f32 1.442695, %v680_v38  ;;  %v689_v41 = vmul.f32 1.442695, %v678_v11 }
 0x4bc   : > { %2767 = vpow2.f32 %v683_v27  ;;  %v695_v50 = vmul.f32 1.442695, %v681_v24  ;;  %v697_v30 = vmul.f32 1.442695, %v682_v19 }
 0x4bd   : > { %2769 = vpow2.f32 %v685_v14 }
 0x4be   : > { %2771 = vpow2.f32 %v691_v36 }
 0x4bf   : > { %2773 = vpow2.f32 %v687_v15 }
 0x4c0   : > { %2775 = vpow2.f32 %v693_v28 }
 0x4c1   : > { %2777 = vpow2.f32 %v689_v41 }
 0x4c2   : > { %2779 = vpow2.f32 %v695_v50 }
 0x4c3   : > { %2781 = vpow2.f32 %v697_v30 }
 0x4c6   : > { %v3369_v31 = vpop.eup %2767 }
 0x4c7   : > { %v3371_v9 = vpop.eup %2769  ;;  %708 = vperm.xlu1 %2754, %v3369_v31  }
 0x4c8   : > { %711 = vperm.xlu0 %2753, %v3371_v9   ;;  %v3375_v35 = vpop.eup %2771 }
 0x4c9   : > { %v3377_v52 = vpop.eup %2773 }
 0x4ca   : > { %v3381_v37 = vpop.eup %2775 }
 0x4cb   : > { %720 = vperm.xlu1 %2754, %v3375_v35   ;;  %v3383_v60 = vpop.eup %2777 }
 0x4cc   : > { %714 = vperm.xlu0 %2753, %v3377_v52   ;;  %v3387_v17 = vpop.eup %2779 }
 0x4cd   : > { %v3390_v33 = vpop.eup %2781 }
 0x4cf   : > { %723 = vperm.xlu1 %2754, %v3381_v37  }
 0x4d0   : > { %717 = vperm.xlu0 %2753, %v3383_v60  }
 0x4d3   : > { %726 = vperm.xlu1 %2754, %v3387_v17  }
 0x4d7   : > { %729 = vperm.xlu1 %2754, %v3390_v33  }
 0x4ed   : > { %v3393_v61 = vpop.xlane.xlu1 %1074  ;;  %v3401_v5 = vpop.xlane.xlu0 %1508 }
 0x4ee   : > { %v1080_v62 = vrot.slane %v3393_v61, %v3057_v20  ;;  %v1084_v63 = vrot.slane %v3393_v61, %v3063_v22  ;;  %v1088_v10 = vrot.slane %v3393_v61, %v3336_v45  ;;  %v1514_v4 = vrot.slane %v3401_v5, %v3057_v20 }
 0x4ef   : > { %v1518_v27 = vrot.slane %v3401_v5, %v3063_v22  ;;  %v1522_v26 = vrot.slane %v3401_v5, %v3336_v45  ;;  %v1526_v50 = vrot.slane %v3401_v5, %v3345_v46 }
 0x4f0   : > { %v1117_v16 = vsub.f32 %v3172_v40, %v1080_v62  ;;  %v1118_v13 = vsub.f32 %v3176_v44, %v1084_v63  ;;  %v1119_v29 = vsub.f32 %v3180_v49, %v1088_v10  ;;  %v1551_v38 = vsub.f32 %v3184_v51, %v1514_v4 }
 0x4f1   : > { %v1092_v40 = vrot.slane %v3393_v61, %v3345_v46  ;;  %v1552_v36 = vsub.f32 %v3188_v54, %v1518_v27  ;;  %v1553_v11 = vsub.f32 %v3195_v59, %v1522_v26  ;;  %v1096_v54 = vrot.slane %v3393_v61, %v3339_v53 }
 0x4f2   : > { %v1125_v18 = vmul.f32 1.442695, %v1117_v16  ;;  %v1127_v14 = vmul.f32 1.442695, %v1118_v13  ;;  %v1129_v44 = vmul.f32 1.442695, %v1119_v29  ;;  %v1554_v13 = vsub.f32 %v3211_v7, %v1526_v50 }
 0x4f3   : > { %v1559_v49 = vmul.f32 1.442695, %v1551_v38  ;;  %v1120_v42 = vsub.f32 %v3192_v58, %v1092_v40  ;;  %v1561_v24 = vmul.f32 1.442695, %v1552_v36  ;;  %v1563_v28 = vmul.f32 1.442695, %v1553_v11 }
 0x4f4   : > { %2783 = vpow2.f32 %v1125_v18  ;;  %v1121_v62 = vsub.f32 %v3208_v6, %v1096_v54  ;;  %v1565_v26 = vmul.f32 1.442695, %v1554_v13 }
 0x4f5   : > { %2785 = vpow2.f32 %v1127_v14  ;;  %v1131_v58 = vmul.f32 1.442695, %v1120_v42  ;;  %v1534_v14 = vrot.slane %v3401_v5, %v3342_v55 }
 0x4f6   : > { %v3417_v15 = vpop.xlane.xlu0 %1942  ;;  %2787 = vpow2.f32 %v1129_v44  ;;  %v1133_v6 = vmul.f32 1.442695, %v1121_v62 }
 0x4f7   : > { %2789 = vpow2.f32 %v1559_v49  ;;  %v1948_v51 = vrot.slane %v3417_v15, %v3057_v20  ;;  %v1952_v41 = vrot.slane %v3417_v15, %v3063_v22  ;;  %v1956_v63 = vrot.slane %v3417_v15, %v3336_v45 }
 0x4f8   : > { %2791 = vpow2.f32 %v1561_v24  ;;  %v1556_v11 = vsub.f32 %v3231_v34, %v1534_v14  ;;  %v1976_v62 = vrot.slane %v3417_v15, %v3361_v43 }
 0x4f9   : > { %v1986_v59 = vsub.f32 %v3200_v0, %v1952_v41  ;;  %2793 = vpow2.f32 %v1563_v28  ;;  %v1985_v30 = vsub.f32 %v3203_v1, %v1948_v51  ;;  %v1530_v0 = vrot.slane %v3401_v5, %v3339_v53 }
 0x4fa   : > { %2795 = vpow2.f32 %v1131_v58  ;;  %v1100_v1 = vrot.slane %v3393_v61, %v3342_v55  ;;  %v1987_v29 = vsub.f32 %v3216_v12, %v1956_v63  ;;  %v1960_v12 = vrot.slane %v3417_v15, %v3345_v46 }
 0x4fb   : > { %v1995_v10 = vmul.f32 1.442695, %v1986_v59  ;;  %v1993_v18 = vmul.f32 1.442695, %v1985_v30  ;;  %v1555_v7 = vsub.f32 %v3223_v23, %v1530_v0  ;;  %v1538_v23 = vrot.slane %v3401_v5, %v3352_v8 }
 0x4fc   : > { %v1122_v40 = vsub.f32 %v3220_v21, %v1100_v1  ;;  %v1997_v44 = vmul.f32 1.442695, %v1987_v29  ;;  %v1104_v21 = vrot.slane %v3393_v61, %v3352_v8  ;;  %v1988_v24 = vsub.f32 %v3228_v32, %v1960_v12  ;;  %v3984_v12 = vld [vmem:[#allocation6_spill] sm:$0xff] }
 0x4fd   : > { %2797 = vpow2.f32 %v1995_v10  ;;  %v1567_v49 = vmul.f32 1.442695, %v1555_v7  ;;  %v1542_v41 = vrot.slane %v3401_v5, %v3361_v43  ;;  %v1557_v34 = vsub.f32 %v3243_v48, %v1538_v23 }
 0x4fe   : > { %v3426_v19 = vpop.eup %2783  ;;  %2799 = vpow2.f32 %v1993_v18  ;;  %v1135_v42 = vmul.f32 1.442695, %v1122_v40  ;;  %v1569_v54 = vmul.f32 1.442695, %v1556_v11  ;;  %v1123_v59 = vsub.f32 %v3236_v39, %v1104_v21 }
 0x4ff   : > { %1150 = vperm.xlu1 %2754, %v3426_v19   ;;  %v3436_v16 = vpop.eup %2785  ;;  %2801 = vpow2.f32 %v1133_v6  ;;  %v1964_v32 = vrot.slane %v3417_v15, %v3339_v53  ;;  %v1999_v58 = vmul.f32 1.442695, %v1988_v24  ;;  %v1558_v5 = vsub.f32 %v3251_v57, %v1542_v41 }
 0x500   : > { %v3442_v4 = vpop.eup %2787  ;;  %2803 = vpow2.f32 %v1565_v26  ;;  %v1571_v48 = vmul.f32 1.442695, %v1557_v34  ;;  %v1108_v39 = vrot.slane %v3393_v61, %v3361_v43  ;;  %v1137_v63 = vmul.f32 1.442695, %v1123_v59 }
 0x501   : > { %v3447_v27 = vpop.eup %2789  ;;  %2805 = vpow2.f32 %v1997_v44  ;;  %v1989_v10 = vsub.f32 %v3240_v47, %v1964_v32  ;;  %v1573_v57 = vmul.f32 1.442695, %v1558_v5  ;;  %v1992_v18 = vsub.f32 %v3259_v3, %v1976_v62 }
 0x502   : > { %1584 = vperm.xlu0 %2753, %v3447_v27   ;;  %v3454_v38 = vpop.eup %2791  ;;  %2807 = vpow2.f32 %v1567_v49  ;;  %v1124_v1 = vsub.f32 %v3248_v56, %v1108_v39  ;;  %v1968_v61 = vrot.slane %v3417_v15, %v3342_v55  ;;  %v1972_v7 = vrot.slane %v3417_v15, %v3352_v8 }
 0x503   : > { %1153 = vperm.xlu1 %2754, %v3436_v16   ;;  %v3459_v36 = vpop.eup %2793  ;;  %2809 = vpow2.f32 %v1135_v42  ;;  %v2001_v47 = vmul.f32 1.442695, %v1989_v10  ;;  %v2007_v14 = vmul.f32 1.442695, %v1992_v18 }
 0x504   : > { %v3469_v28 = vpop.eup %2795  ;;  %2811 = vpow2.f32 %v1569_v54  ;;  %v1139_v3 = vmul.f32 1.442695, %v1124_v1  ;;  %v1990_v56 = vsub.f32 %v3256_v2, %v1968_v61  ;;  %v1991_v44 = vsub.f32 %v3984_v12, %v1972_v7 }
 0x505   : > { %2813 = vpow2.f32 %v1999_v58 }
 0x506   : > { %1590 = vperm.xlu0 %2753, %v3459_v36   ;;  %2815 = vpow2.f32 %v1571_v48  ;;  %v2003_v23 = vmul.f32 1.442695, %v1990_v56  ;;  %v2005_v2 = vmul.f32 1.442695, %v1991_v44 }
 0x507   : > { %1156 = vperm.xlu1 %2754, %v3442_v4   ;;  %v3471_v51 = vpop.eup %2797  ;;  %2817 = vpow2.f32 %v1137_v63 }
 0x508   : > { %v3481_v50 = vpop.eup %2799  ;;  %2819 = vpow2.f32 %v1573_v57 }
 0x509   : > { %v3483_v30 = vpop.eup %2801  ;;  %2821 = vpow2.f32 %v2001_v47 }
 0x50a   : > { %2021 = vperm.xlu0 %2753, %v3471_v51   ;;  %v3493_v0 = vpop.eup %2803  ;;  %2823 = vpow2.f32 %v2007_v14 }
 0x50b   : > { %1587 = vperm.xlu1 %2754, %v3454_v38   ;;  %v3495_v13 = vpop.eup %2805  ;;  %2825 = vpow2.f32 %v1139_v3 }
 0x50c   : > { %v3503_v6 = vpop.eup %2807  ;;  %2827 = vpow2.f32 %v2003_v23 }
 0x50d   : > { %v3505_v29 = vpop.eup %2809  ;;  %2829 = vpow2.f32 %v2005_v2 }
 0x50e   : > { %1162 = vperm.xlu0 %2753, %v3483_v30   ;;  %v3512_v26 = vpop.eup %2811 }
 0x50f   : > { %1159 = vperm.xlu1 %2754, %v3469_v28   ;;  %v3514_v40 = vpop.eup %2813 }
 0x510   : > { %v3519_v11 = vpop.eup %2815 }
 0x511   : > { %v3521_v49 = vpop.eup %2817 }
 0x512   : > { %2024 = vperm.xlu0 %2753, %v3495_v13   ;;  %v3525_v15 = vpop.eup %2819 }
 0x513   : > { %2018 = vperm.xlu1 %2754, %v3481_v50   ;;  %3985 = vst [vmem:[#allocation6_spill] sm:$0xff] %v3525_v15  ;;  %v3527_v21 = vpop.eup %2821 }
 0x514   : > { %v3531_v42 = vpop.eup %2823 }
 0x515   : > { %3986 = vst [vmem:[#allocation7_spill] sm:$0xff] %v3531_v42  ;;  %v3533_v24 = vpop.eup %2825 }
 0x516   : > { %1165 = vperm.xlu0 %2753, %v3505_v29   ;;  %3987 = vst [vmem:[#allocation8_spill] sm:$0xff] %v3533_v24  ;;  %v3537_v41 = vpop.eup %2827 }
 0x517   : > { %1593 = vperm.xlu1 %2754, %v3493_v0   ;;  %3988 = vst [vmem:[#allocation9_spill] sm:$0xff] %v3537_v41  ;;  %v3540_v34 = vpop.eup %2829 }
 0x518   : > { %3989 = vst [vmem:[#allocation10_spill] sm:$0xff] %v3540_v34 }
 0x51a   : > { %2027 = vperm.xlu0 %2753, %v3514_v40  }
 0x51b   : > { %1596 = vperm.xlu1 %2754, %v3503_v6  }
 0x51e   : > { %1168 = vperm.xlu0 %2753, %v3521_v49  }
 0x51f   : > { %1599 = vperm.xlu1 %2754, %v3512_v26  }
 0x522   : > { %2030 = vperm.xlu0 %2753, %v3527_v21  }
 0x523   : > { %1602 = vperm.xlu1 %2754, %v3519_v11  }
 0x526   : > { %1171 = vperm.xlu0 %2753, %v3533_v24  }
 0x527   : > { %1605 = vperm.xlu1 %2754, %v3525_v15  }
 0x52a   : > { %2033 = vperm.xlu0 %2753, %v3537_v41  }
 0x52b   : > { %2039 = vperm.xlu1 %2754, %v3531_v42  }
 0x52e   : > { %2036 = vperm.xlu0 %2753, %v3540_v34  }
 0x546   : > { %v709_v54 = vpop.permute.xlu1 %708 }
 0x547   : > { %v712_v59 = vpop.permute.xlu0 %711  ;;  %v734_v5 = vrot.slane %v709_v54, %v3269_v25 }
 0x548   : > { %v738_v48 = vrot.slane %v712_v59, %v3269_v25 }
 0x54a   : > { %v721_v32 = vpop.permute.xlu1 %720  ;;  %v763_v10 = vsel %vm616_vm3, %v738_v48, %v734_v5 }
 0x54b   : > { %v715_v58 = vpop.permute.xlu0 %714  ;;  %v750_v18 = vrot.slane %v721_v32, %v3269_v25 }
 0x54c   : > { %v742_v62 = vrot.slane %v715_v58, %v3269_v25 }
 0x54e   : > { %v724_v39 = vpop.permute.xlu1 %723  ;;  %v764_v1 = vsel %vm618_vm4, %v742_v62, %v763_v10 }
 0x54f   : > { %v718_v63 = vpop.permute.xlu0 %717  ;;  %v754_v14 = vrot.slane %v724_v39, %v3269_v25 }
 0x550   : > { %v746_v57 = vrot.slane %v718_v63, %v3269_v25 }
 0x552   : > { %v765_v61 = vsel %vm620_vm5, %v746_v57, %v764_v1  ;;  %v727_v47 = vpop.permute.xlu1 %726 }
 0x553   : > { %v766_v3 = vsel %vm622_vm6, %v750_v18, %v765_v61  ;;  %v758_v7 = vrot.slane %v727_v47, %v3269_v25 }
 0x554   : > { %v767_v56 = vsel %vm624_vm7, %v754_v14, %v766_v3 }
 0x555   : > { %v768_v23 = vsel %vm626_vm8, %v758_v7, %v767_v56 }
 0x556   : > { %v730_v12 = vpop.permute.xlu1 %729 }
 0x557   : > { %v762_v44 = vrot.slane %v730_v12, %v3269_v25 }
 0x559   : > { %v769_v2 = vsel %vm628_vm9, %v762_v44, %v768_v23 }
 0x55a   : > { %v771_v54 = vsel %vm500_vm2, %v769_v2, 0.0 }
 0x55b   : > { %772 = vadd.xlane.f32.xlu0 %v771_v54 }
 0x57e   : > { %v1151_v59 = vpop.permute.xlu1 %1150 }
 0x57f   : > { %v1176_v15 = vrot.slane %v1151_v59, %v3269_v25 }
 0x581   : > { %v1585_v58 = vpop.permute.xlu0 %1584 }
 0x582   : > { %v1154_v32 = vpop.permute.xlu1 %1153  ;;  %v1610_v7 = vrot.slane %v1585_v58, %v3269_v25 }
 0x583   : > { %v1180_v23 = vrot.slane %v1154_v32, %v3269_v25 }
 0x585   : > { %v1591_v48 = vpop.permute.xlu0 %1590 }
 0x586   : > { %v1157_v5 = vpop.permute.xlu1 %1156  ;;  %v1618_v2 = vrot.slane %v1591_v48, %v3269_v25  ;;  %v1205_v48 = vsel %vm616_vm3, %v1180_v23, %v1176_v15 }
 0x587   : > { %v1184_v42 = vrot.slane %v1157_v5, %v3269_v25 }
 0x589   : > { %v2022_v63 = vpop.permute.xlu0 %2021  ;;  %v1206_v5 = vsel %vm618_vm4, %v1184_v42, %v1205_v48 }
 0x58a   : > { %v1588_v62 = vpop.permute.xlu1 %1587 }
 0x58b   : > { %v1614_v14 = vrot.slane %v1588_v62, %v3269_v25 }
 0x58d   : > { %v1163_v57 = vpop.permute.xlu0 %1162  ;;  %v1639_v12 = vsel %vm616_vm3, %v1614_v14, %v1610_v7 }
 0x58e   : > { %v1160_v39 = vpop.permute.xlu1 %1159  ;;  %v1640_v14 = vsel %vm618_vm4, %v1618_v2, %v1639_v12 }
 0x58f   : > { %v1188_v58 = vrot.slane %v1160_v39, %v3269_v25 }
 0x591   : > { %v2025_v1 = vpop.permute.xlu0 %2024  ;;  %v1207_v39 = vsel %vm620_vm5, %v1188_v58, %v1206_v5 }
 0x592   : > { %v2019_v10 = vpop.permute.xlu1 %2018  ;;  %v2052_v48 = vrot.slane %v2025_v1, %v3269_v25 }
 0x593   : > { %v2044_v42 = vrot.slane %v2019_v10, %v3269_v25 }
 0x595   : > { %v1166_v47 = vpop.permute.xlu0 %1165 }
 0x596   : > { %v1594_v18 = vpop.permute.xlu1 %1593  ;;  %v1196_v12 = vrot.slane %v1166_v47, %v3269_v25 }
 0x597   : > { %v1622_v44 = vrot.slane %v1594_v18, %v3269_v25 }
 0x599   : > { %v2028_v56 = vpop.permute.xlu0 %2027  ;;  %v1641_v32 = vsel %vm620_vm5, %v1622_v44, %v1640_v14  ;;  %v1192_v44 = vrot.slane %v1163_v57, %v3269_v25 }
 0x59a   : > { %v1597_v61 = vpop.permute.xlu1 %1596 }
 0x59b   : > { %v1626_v54 = vrot.slane %v1597_v61, %v3269_v25 }
 0x59d   : > { %v1169_v41 = vpop.permute.xlu0 %1168  ;;  %v1642_v61 = vsel %vm622_vm6, %v1626_v54, %v1641_v32  ;;  %v1208_v54 = vsel %vm622_vm6, %v1192_v44, %v1207_v39 }
 0x59e   : > { %v1600_v3 = vpop.permute.xlu1 %1599  ;;  %v1200_v15 = vrot.slane %v1169_v41, %v3269_v25  ;;  %v1209_v58 = vsel %vm624_vm7, %v1196_v12, %v1208_v54 }
 0x59f   : > { %v1630_v62 = vrot.slane %v1600_v3, %v3269_v25 }
 0x5a0   : > { %v1210_v57 = vsel %vm626_vm8, %v1200_v15, %v1209_v58 }
 0x5a1   : > { %v1643_v24 = vsel %vm624_vm7, %v1630_v62, %v1642_v61  ;;  %v2031_v3 = vpop.permute.xlu0 %2030 }
 0x5a2   : > { %v1603_v34 = vpop.permute.xlu1 %1602  ;;  %v2060_v61 = vrot.slane %v2031_v3, %v3269_v25 }
 0x5a3   : > { %v1634_v18 = vrot.slane %v1603_v34, %v3269_v25 }
 0x5a5   : > { %v1644_v34 = vsel %vm626_vm8, %v1634_v18, %v1643_v24  ;;  %v1172_v62 = vpop.permute.xlu0 %1171  ;;  %v2048_v24 = vrot.slane %v2022_v63, %v3269_v25  ;;  %v2056_v18 = vrot.slane %v2028_v56, %v3269_v25 }
 0x5a6   : > { %v1606_v7 = vpop.permute.xlu1 %1605  ;;  %v1204_v47 = vrot.slane %v1172_v62, %v3269_v25 }
 0x5a7   : > { %v1638_v59 = vrot.slane %v1606_v7, %v3269_v25  ;;  %v2073_v14 = vsel %vm616_vm3, %v2048_v24, %v2044_v42 }
 0x5a8   : > { %v1211_v41 = vsel %vm628_vm9, %v1204_v47, %v1210_v57  ;;  %v2074_v63 = vsel %vm618_vm4, %v2052_v48, %v2073_v14 }
 0x5a9   : > { %v1645_v23 = vsel %vm628_vm9, %v1638_v59, %v1644_v34  ;;  %v2034_v32 = vpop.permute.xlu0 %2033  ;;  %v1213_v10 = vsel %vm500_vm2, %v1211_v41, 0.0  ;;  %v2075_v59 = vsel %vm620_vm5, %v2056_v18, %v2074_v63 }
 0x5aa   : > { %v1647_v2 = vsel %vm500_vm2, %v1645_v23, 0.0  ;;  %1214 = vadd.xlane.f32.xlu1 %v1213_v10  ;;  %v2064_v7 = vrot.slane %v2034_v32, %v3269_v25  ;;  %v2040_v5 = vpop.permute.xlu1 %2039  ;;  %v2076_v12 = vsel %vm622_vm6, %v2060_v61, %v2075_v59 }
 0x5ab   : > { %1648 = vadd.xlane.f32.xlu0 %v1647_v2  ;;  %v2072_v44 = vrot.slane %v2040_v5, %v3269_v25 }
 0x5ac   : > { %v2077_v34 = vsel %vm624_vm7, %v2064_v7, %v2076_v12 }
 0x5ad   : > { %v2037_v39 = vpop.permute.xlu0 %2036 }
 0x5ae   : > { %v2068_v56 = vrot.slane %v2037_v39, %v3269_v25 }
 0x5b0   : > { %v2078_v1 = vsel %vm626_vm8, %v2068_v56, %v2077_v34 }
 0x5b1   : > { %v2079_v3 = vsel %vm628_vm9, %v2072_v44, %v2078_v1 }
 0x5b2   : > { %v2081_v15 = vsel %vm500_vm2, %v2079_v3, 0.0 }
 0x5b3   : > { %2082 = vadd.xlane.f32.xlu0 %v2081_v15 }
 0x5e8   : > { %v773_v23 = vpop.xlane.xlu0 %772 }
 0x5e9   : > { %2831 = vrcp.f32 %v773_v23 }
 0x5f3   : > { %v2832_v2 = vpop.eup %2831 }
 0x5f4   : > { %v783_v42 = vrot.slane %v2832_v2, %v3063_v22  ;;  %v779_v54 = vrot.slane %v2832_v2, %v3057_v20  ;;  %v787_v25 = vrot.slane %v2832_v2, %v3336_v45  ;;  %v795_v47 = vrot.slane %v2832_v2, %v3339_v53 }
 0x5f5   : > { %v791_v41 = vrot.slane %v2832_v2, %v3345_v46  ;;  %v799_v14 = vrot.slane %v2832_v2, %v3342_v55  ;;  %v803_v18 = vrot.slane %v2832_v2, %v3352_v8 }
 0x5f6   : > { %v817_v62 = vmul.f32 %v3371_v9, %v783_v42  ;;  %v816_v58 = vmul.f32 %v3369_v31, %v779_v54  ;;  %v818_v24 = vmul.f32 %v3377_v52, %v787_v25  ;;  %v820_v57 = vmul.f32 %v3375_v35, %v795_v47 }
 0x5f7   : > { %v819_v9 = vmul.f32 %v3383_v60, %v791_v41  ;;  %v821_v31 = vmul.f32 %v3381_v37, %v799_v14  ;;  %v822_v32 = vmul.f32 %v3387_v17, %v803_v18  ;;  %v807_v52 = vrot.slane %v2832_v2, %v3361_v43  ;;  %v3990_v41 = vld [vmem:[#allocation8_spill] sm:$0xff] }
 0x5f8   : > { %831 = vperm.xlu0 %2753, %v817_v62   ;;  %826 = vperm.xlu1 %2754, %v816_v58  }
 0x5f9   : > { %v823_v35 = vmul.f32 %v3390_v33, %v807_v52 }
 0x5fc   : > { %836 = vperm.xlu0 %2753, %v818_v24   ;;  %846 = vperm.xlu1 %2754, %v820_v57  }
 0x600   : > { %841 = vperm.xlu0 %2753, %v819_v9   ;;  %851 = vperm.xlu1 %2754, %v821_v31  }
 0x604   : > { %856 = vperm.xlu1 %2754, %v822_v32  }
 0x608   : > { %861 = vperm.xlu1 %2754, %v823_v35  }
 0x637   : > { %v1215_v48 = vpop.xlane.xlu1 %1214 }
 0x638   : > { %v1649_v10 = vpop.xlane.xlu0 %1648 }
 0x639   : > { %2833 = vrcp.f32 %v1649_v10  ;;  %v3994_v10 = vld [vmem:[#allocation10_spill] sm:$0xff] }
 0x63a   : > { %2835 = vrcp.f32 %v1215_v48 }
 0x640   : > { %v2083_v60 = vpop.xlane.xlu0 %2082 }
 0x641   : > { %2837 = vrcp.f32 %v2083_v60 }
 0x643   : > { %v3623_v61 = vpop.eup %2833 }
 0x644   : > { %v1655_v37 = vrot.slane %v3623_v61, %v3057_v20  ;;  %v1663_v17 = vrot.slane %v3623_v61, %v3336_v45  ;;  %v2836_v63 = vpop.eup %2835  ;;  %v1659_v1 = vrot.slane %v3623_v61, %v3063_v22  ;;  %v1667_v54 = vrot.slane %v3623_v61, %v3345_v46 }
 0x645   : > { %v1221_v33 = vrot.slane %v2836_v63, %v3057_v20  ;;  %v1225_v39 = vrot.slane %v2836_v63, %v3063_v22  ;;  %v1241_v42 = vrot.slane %v2836_v63, %v3342_v55  ;;  %v1245_v58 = vrot.slane %v2836_v63, %v3352_v8 }
 0x646   : > { %v1692_v7 = vmul.f32 %v3447_v27, %v1655_v37  ;;  %v1694_v5 = vmul.f32 %v3459_v36, %v1663_v17  ;;  %v1229_v27 = vrot.slane %v2836_v63, %v3336_v45  ;;  %v1693_v3 = vmul.f32 %v3454_v38, %v1659_v1  ;;  %v3995_v17 = vld [vmem:[#allocation5_spill] sm:$0xff] }
 0x647   : > { %v1258_v59 = vmul.f32 %v3426_v19, %v1221_v33  ;;  %v1259_v12 = vmul.f32 %v3436_v16, %v1225_v39  ;;  %v1237_v19 = vrot.slane %v2836_v63, %v3339_v53  ;;  %v1233_v16 = vrot.slane %v2836_v63, %v3345_v46 }
 0x648   : > { %1702 = vperm.xlu0 %2753, %v1692_v7   ;;  %v1260_v44 = vmul.f32 %v3442_v4, %v1229_v27  ;;  %v1264_v25 = vmul.f32 %v3521_v49, %v1245_v58  ;;  %v1249_v57 = vrot.slane %v2836_v63, %v3361_v43  ;;  %v1683_v49 = vrot.slane %v3623_v61, %v3361_v43 }
 0x649   : > { %1268 = vperm.xlu1 %2754, %v1258_v59   ;;  %v1262_v15 = vmul.f32 %v3483_v30, %v1237_v19  ;;  %v1261_v4 = vmul.f32 %v3469_v28, %v1233_v16  ;;  %v1263_v30 = vmul.f32 %v3505_v29, %v1241_v42  ;;  %v1695_v28 = vmul.f32 %v3493_v0, %v1667_v54 }
 0x64a   : > { %v1675_v29 = vrot.slane %v3623_v61, %v3342_v55  ;;  %v1265_v14 = vmul.f32 %v3990_v41, %v1249_v57 }
 0x64b   : > { %v2838_v56 = vpop.eup %2837 }
 0x64c   : > { %1712 = vperm.xlu0 %2753, %v1694_v5   ;;  %v2093_v34 = vrot.slane %v2838_v56, %v3063_v22  ;;  %v2097_v23 = vrot.slane %v2838_v56, %v3336_v45  ;;  %v2089_v2 = vrot.slane %v2838_v56, %v3057_v20  ;;  %v2101_v62 = vrot.slane %v2838_v56, %v3345_v46 }
 0x64d   : > { %1273 = vperm.xlu1 %2754, %v1259_v12   ;;  %v1671_v20 = vrot.slane %v3623_v61, %v3339_v53  ;;  %v2105_v47 = vrot.slane %v2838_v56, %v3339_v53  ;;  %v1697_v0 = vmul.f32 %v3512_v26, %v1675_v29  ;;  %v2109_v9 = vrot.slane %v2838_v56, %v3342_v55  ;;  %v3991_v26 = vld [vmem:[#allocation6_spill] sm:$0xff] }
 0x64e   : > { %v2127_v36 = vmul.f32 %v3471_v51, %v2093_v34  ;;  %v2128_v51 = vmul.f32 %v3495_v13, %v2097_v23  ;;  %v2126_v38 = vmul.f32 %v3481_v50, %v2089_v2  ;;  %v2129_v13 = vmul.f32 %v3514_v40, %v2101_v62 }
 0x64f   : > { %v1696_v50 = vmul.f32 %v3503_v6, %v1671_v20  ;;  %v1679_v40 = vrot.slane %v3623_v61, %v3352_v8  ;;  %v2130_v24 = vmul.f32 %v3527_v21, %v2105_v47  ;;  %v1699_v31 = vmul.f32 %v3991_v26, %v1683_v49  ;;  %v3992_v21 = vld [vmem:[#allocation9_spill] sm:$0xff] }
 0x650   : > { %2141 = vperm.xlu0 %2753, %v2127_v36   ;;  %v2117_v18 = vrot.slane %v2838_v56, %v3361_v43  ;;  %v2131_v32 = vmul.f32 %v3992_v21, %v2109_v9  ;;  %v2113_v52 = vrot.slane %v2838_v56, %v3352_v8 }
 0x651   : > { %1278 = vperm.xlu1 %2754, %v1260_v44   ;;  %v1698_v6 = vmul.f32 %v3519_v11, %v1679_v40  ;;  %v3993_v11 = vld [vmem:[#allocation7_spill] sm:$0xff] }
 0x652   : > { %v2133_v35 = vmul.f32 %v3993_v11, %v2117_v18  ;;  %v2132_v48 = vmul.f32 %v3994_v10, %v2113_v52 }
 0x654   : > { %1288 = vperm.xlu0 %2753, %v1262_v15  }
 0x655   : > { %1707 = vperm.xlu1 %2754, %v1693_v3  }
 0x658   : > { %2146 = vperm.xlu0 %2753, %v2128_v51  }
 0x659   : > { %1283 = vperm.xlu1 %2754, %v1261_v4  }
 0x65c   : > { %1293 = vperm.xlu0 %2753, %v1263_v30  }
 0x65d   : > { %2136 = vperm.xlu1 %2754, %v2126_v38  }
 0x660   : > { %2151 = vperm.xlu0 %2753, %v2129_v13  }
 0x661   : > { %1717 = vperm.xlu1 %2754, %v1695_v28  }
 0x664   : > { %1298 = vperm.xlu0 %2753, %v1264_v25  }
 0x665   : > { %1722 = vperm.xlu1 %2754, %v1696_v50  }
 0x668   : > { %2156 = vperm.xlu0 %2753, %v2130_v24  }
 0x669   : > { %1727 = vperm.xlu1 %2754, %v1697_v0  }
 0x66c   : > { %1303 = vperm.xlu0 %2753, %v1265_v14  }
 0x66d   : > { %1732 = vperm.xlu1 %2754, %v1698_v6  }
 0x670   : > { %2161 = vperm.xlu0 %2753, %v2131_v32  }
 0x671   : > { %1737 = vperm.xlu1 %2754, %v1699_v31  }
 0x674   : > { %2166 = vperm.xlu0 %2753, %v2132_v48  }
 0x675   : > { %2171 = vperm.xlu1 %2754, %v2133_v35  }
 0x677   : > { %v832_v61 = vpop.permute.xlu0 %831  ;;  %v827_v37 = vpop.permute.xlu1 %826 }
 0x678   : > { %v864_v63 = vmul.f32 %v827_v37, %v3995_v17  ;;  %v865_v43 = vmul.f32 %v832_v61, %v3995_v17 }
 0x67a   : > { %v873_v59 = vsel %vm872_vm10, %v864_v63, 0.0  ;;  %v880_v39 = vsel %vm872_vm10, %v865_v43, 0.0 }
 0x67b   : > { %v837_v60 = vpop.permute.xlu0 %836  ;;  %v847_v7 = vpop.permute.xlu1 %846  ;;  %v874_v56 = vrot.slane %v873_v59, 4  ;;  %v881_v34 = vrot.slane %v880_v39, 4 }
 0x67c   : > { %v866_v8 = vmul.f32 %v837_v60, %v3995_v17  ;;  %v868_v1 = vmul.f32 %v847_v7, %v3995_v17 }
 0x67d   : > { %v875_v16 = vadd.f32 %v874_v56, %v873_v59  ;;  %v882_v15 = vadd.f32 %v881_v34, %v880_v39 }
 0x67e   : > { %v887_v27 = vsel %vm872_vm10, %v866_v8, 0.0  ;;  %v901_v23 = vsel %vm872_vm10, %v868_v1, 0.0 }
 0x67f   : > { %v842_v33 = vpop.permute.xlu0 %841  ;;  %v852_v12 = vpop.permute.xlu1 %851  ;;  %v888_v36 = vrot.slane %v887_v27, 4  ;;  %v876_v38 = vrot.slane %v875_v16, 2  ;;  %v883_v54 = vrot.slane %v882_v15, 2  ;;  %v902_v30 = vrot.slane %v901_v23, 4 }
 0x680   : > { %v867_v5 = vmul.f32 %v842_v33, %v3995_v17  ;;  %v869_v2 = vmul.f32 %v852_v12, %v3995_v17 }
 0x681   : > { %v889_v4 = vadd.f32 %v888_v36, %v887_v27  ;;  %v877_v50 = vadd.f32 %v876_v38, %v875_v16  ;;  %v884_v29 = vadd.f32 %v883_v54, %v882_v15  ;;  %v903_v25 = vadd.f32 %v902_v30, %v901_v23 }
 0x682   : > { %v894_v44 = vsel %vm872_vm10, %v867_v5, 0.0  ;;  %v908_v20 = vsel %vm872_vm10, %v869_v2, 0.0 }
 0x683   : > { %v895_v19 = vrot.slane %v894_v44, 4  ;;  %v857_v3 = vpop.permute.xlu1 %856  ;;  %v890_v28 = vrot.slane %v889_v4, 2  ;;  %v909_v0 = vrot.slane %v908_v20, 4  ;;  %v878_v49 = vrot.slane %v877_v50, 1 }
 0x684   : > { %v870_v42 = vmul.f32 %v857_v3, %v3995_v17  ;;  %v885_v41 = vrot.slane %v884_v29, 1  ;;  %v904_v14 = vrot.slane %v903_v25, 2 }
 0x685   : > { %v896_v51 = vadd.f32 %v895_v19, %v894_v44  ;;  %v891_v24 = vadd.f32 %v890_v28, %v889_v4  ;;  %v910_v26 = vadd.f32 %v909_v0, %v908_v20  ;;  %v879_v10 = vadd.f32 %v878_v49, %v877_v50 }
 0x686   : > { %v915_v58 = vsel %vm872_vm10, %v870_v42, 0.0  ;;  %v886_v48 = vadd.f32 %v885_v41, %v884_v29  ;;  %v905_v61 = vadd.f32 %v904_v14, %v903_v25 }
 0x687   : > { %v862_v62 = vpop.permute.xlu1 %861  ;;  %v897_v13 = vrot.slane %v896_v51, 2  ;;  %v916_v57 = vrot.slane %v915_v58, 4  ;;  %v892_v18 = vrot.slane %v891_v24, 1  ;;  %v911_v37 = vrot.slane %v910_v26, 2 }
 0x688   : > { %v871_v47 = vmul.f32 %v862_v62, %v3995_v17  ;;  %v2247_v12 = vsel %vm616_vm3, %v886_v48, %v879_v10  ;;  %v906_v27 = vrot.slane %v905_v61, 1 }
 0x689   : > { %v898_v6 = vadd.f32 %v897_v13, %v896_v51  ;;  %v917_v21 = vadd.f32 %v916_v57, %v915_v58  ;;  %v893_v43 = vadd.f32 %v892_v18, %v891_v24  ;;  %v912_v34 = vadd.f32 %v911_v37, %v910_v26 }
 0x68a   : > { %v922_v9 = vsel %vm872_vm10, %v871_v47, 0.0  ;;  %v907_v62 = vadd.f32 %v906_v27, %v905_v61 }
 0x68b   : > { %v899_v11 = vrot.slane %v898_v6, 1  ;;  %v923_v35 = vrot.slane %v922_v9, 4  ;;  %v918_v33 = vrot.slane %v917_v21, 2  ;;  %v2248_v19 = vsel %vm618_vm4, %v893_v43, %v2247_v12 }
 0x68c   : > { %v913_v28 = vrot.slane %v912_v34, 1 }
 0x68d   : > { %v900_v5 = vadd.f32 %v899_v11, %v898_v6  ;;  %v924_v59 = vadd.f32 %v923_v35, %v922_v9  ;;  %v919_v3 = vadd.f32 %v918_v33, %v917_v21 }
 0x68e   : > { %v914_v14 = vadd.f32 %v913_v28, %v912_v34 }
 0x68f   : > { %v2249_v23 = vsel %vm620_vm5, %v900_v5, %v2248_v19  ;;  %v925_v4 = vrot.slane %v924_v59, 2  ;;  %v920_v58 = vrot.slane %v919_v3, 1 }
 0x690   : > { %v2250_v25 = vsel %vm622_vm6, %v907_v62, %v2249_v23 }
 0x691   : > { %v926_v47 = vadd.f32 %v925_v4, %v924_v59  ;;  %v2251_v61 = vsel %vm624_vm7, %v914_v14, %v2250_v25 }
 0x693   : > { %v927_v11 = vrot.slane %v926_v47, 1 }
 0x6c7   : > { %v1703_v40 = vpop.permute.xlu0 %1702 }
 0x6c8   : > { %v1740_v31 = vmul.f32 %v1703_v40, %v3995_v17  ;;  %v1269_v32 = vpop.permute.xlu1 %1268 }
 0x6c9   : > { %v1306_v60 = vmul.f32 %v1269_v32, %v3995_v17 }
 0x6ca   : > { %v1749_v7 = vsel %vm1748_vm11, %v1740_v31, 0.0  ;;  %v921_v31 = vadd.f32 %v920_v58, %v919_v3 }
 0x6cb   : > { %v1713_v52 = vpop.permute.xlu0 %1712  ;;  %v1750_v56 = vrot.slane %v1749_v7, 4  ;;  %v1315_v44 = vsel %vm1314_vm12, %v1306_v60, 0.0 }
 0x6cc   : > { %v1742_v63 = vmul.f32 %v1713_v52, %v3995_v17  ;;  %v1274_v8 = vpop.permute.xlu1 %1273  ;;  %v1316_v42 = vrot.slane %v1315_v44, 4  ;;  %v2252_v27 = vsel %vm626_vm8, %v921_v31, %v2251_v61 }
 0x6cd   : > { %v1307_v39 = vmul.f32 %v1274_v8, %v3995_v17  ;;  %v1751_v38 = vadd.f32 %v1750_v56, %v1749_v7  ;;  %v928_v56 = vadd.f32 %v927_v11, %v926_v47 }
 0x6ce   : > { %v1763_v36 = vsel %vm1748_vm11, %v1742_v63, 0.0  ;;  %v1317_v57 = vadd.f32 %v1316_v42, %v1315_v44 }
 0x6cf   : > { %v1322_v1 = vsel %vm1314_vm12, %v1307_v39, 0.0  ;;  %v2142_v51 = vpop.permute.xlu0 %2141  ;;  %v1764_v54 = vrot.slane %v1763_v36, 4  ;;  %v1752_v6 = vrot.slane %v1751_v38, 2 }
 0x6d0   : > { %v1323_v16 = vrot.slane %v1322_v1, 4  ;;  %v1279_v15 = vpop.permute.xlu1 %1278  ;;  %v2175_v30 = vmul.f32 %v2142_v51, %v3995_v17  ;;  %v1318_v37 = vrot.slane %v1317_v57, 2 }
 0x6d1   : > { %v1308_v2 = vmul.f32 %v1279_v15, %v3995_v17  ;;  %v1765_v49 = vadd.f32 %v1764_v54, %v1763_v36  ;;  %v1753_v60 = vadd.f32 %v1752_v6, %v1751_v38 }
 0x6d2   : > { %v1324_v20 = vadd.f32 %v1323_v16, %v1322_v1  ;;  %v2190_v0 = vsel %vm2182_vm13, %v2175_v30, 0.0  ;;  %v1319_v19 = vadd.f32 %v1318_v37, %v1317_v57 }
 0x6d3   : > { %v1329_v13 = vsel %vm1314_vm12, %v1308_v2, 0.0  ;;  %v1289_v24 = vpop.permute.xlu0 %1288  ;;  %v2191_v21 = vrot.slane %v2190_v0, 4  ;;  %v1766_v7 = vrot.slane %v1765_v49, 2  ;;  %v1754_v3 = vrot.slane %v1753_v60, 1 }
 0x6d4   : > { %v1330_v50 = vrot.slane %v1329_v13, 4  ;;  %v1708_v29 = vpop.permute.xlu1 %1707  ;;  %v1310_v41 = vmul.f32 %v1289_v24, %v3995_v17  ;;  %v1325_v9 = vrot.slane %v1324_v20, 2 }
 0x6d5   : > { %v1741_v40 = vmul.f32 %v1708_v29, %v3995_v17  ;;  %v2192_v59 = vadd.f32 %v2191_v21, %v2190_v0  ;;  %v1767_v16 = vadd.f32 %v1766_v7, %v1765_v49  ;;  %v1320_v29 = vrot.slane %v1319_v19, 1 }
 0x6d6   : > { %v1331_v18 = vadd.f32 %v1330_v50, %v1329_v13  ;;  %v1343_v32 = vsel %vm1314_vm12, %v1310_v41, 0.0  ;;  %v1326_v43 = vadd.f32 %v1325_v9, %v1324_v20  ;;  %v3729_v0 = vsel %vm628_vm9, %v928_v56, %v2252_v27 }
 0x6d7   : > { %v1756_v26 = vsel %vm1748_vm11, %v1741_v40, 0.0  ;;  %v2147_v48 = vpop.permute.xlu0 %2146  ;;  %v1344_v33 = vrot.slane %v1343_v32, 4  ;;  %v2193_v38 = vrot.slane %v2192_v59, 2  ;;  %v1768_v25 = vrot.slane %v1767_v16, 1 }
 0x6d8   : > { %v1284_v52 = vpop.permute.xlu1 %1283  ;;  %v1757_v35 = vrot.slane %v1756_v26, 4  ;;  %v2176_v63 = vmul.f32 %v2147_v48, %v3995_v17  ;;  %v1332_v5 = vrot.slane %v1331_v18, 2  ;;  %v1327_v23 = vrot.slane %v1326_v43, 1 }
 0x6d9   : > { %v1309_v10 = vmul.f32 %v1284_v52, %v3995_v17  ;;  %v1345_v4 = vadd.f32 %v1344_v33, %v1343_v32  ;;  %v2194_v49 = vadd.f32 %v2193_v38, %v2192_v59  ;;  %v3733_v31 = vadd.f32 %v1754_v3, %v1753_v60 }
 0x6da   : > { %v1758_v34 = vadd.f32 %v1757_v35, %v1756_v26  ;;  %v2197_v44 = vsel %vm2182_vm13, %v2176_v63, 0.0  ;;  %v1333_v42 = vadd.f32 %v1332_v5, %v1331_v18  ;;  %v1328_v18 = vadd.f32 %v1327_v23, %v1326_v43 }
 0x6db   : > { %v1336_v8 = vsel %vm1314_vm12, %v1309_v10, 0.0  ;;  %v1294_v36 = vpop.permute.xlu0 %1293  ;;  %v2198_v30 = vrot.slane %v2197_v44, 4  ;;  %v1346_v40 = vrot.slane %v1345_v4, 2  ;;  %v1321_v11 = vadd.f32 %v1320_v29, %v1319_v19 }
 0x6dc   : > { %v1337_v39 = vrot.slane %v1336_v8, 4  ;;  %v2137_v12 = vpop.permute.xlu1 %2136  ;;  %v1311_v51 = vmul.f32 %v1294_v36, %v3995_v17  ;;  %v1759_v28 = vrot.slane %v1758_v34, 2  ;;  %v1334_v21 = vrot.slane %v1333_v42, 1 }
 0x6dd   : > { %v2174_v1 = vmul.f32 %v2137_v12, %v3995_v17  ;;  %v2199_v41 = vadd.f32 %v2198_v30, %v2197_v44  ;;  %v1347_v61 = vadd.f32 %v1346_v40, %v1345_v4  ;;  %v3738_v33 = vadd.f32 %v1768_v25, %v1767_v16 }
 0x6de   : > { %v1338_v15 = vadd.f32 %v1337_v39, %v1336_v8  ;;  %v1350_v13 = vsel %vm1314_vm12, %v1311_v51, 0.0  ;;  %v1760_v32 = vadd.f32 %v1759_v28, %v1758_v34  ;;  %v2195_v8 = vrot.slane %v2194_v49, 1 }
 0x6df   : > { %v2183_v2 = vsel %vm2182_vm13, %v2174_v1, 0.0  ;;  %v2152_v50 = vpop.permute.xlu0 %2151  ;;  %v1351_v47 = vrot.slane %v1350_v13, 4  ;;  %v2200_v60 = vrot.slane %v2199_v41, 2  ;;  %v2265_v59 = vsel %vm616_vm3, %v1328_v18, %v1321_v11 }
 0x6e0   : > { %v1339_v54 = vrot.slane %v1338_v15, 2  ;;  %v1718_v62 = vpop.permute.xlu1 %1717  ;;  %v2184_v20 = vrot.slane %v2183_v2, 4  ;;  %v2177_v6 = vmul.f32 %v2152_v50, %v3995_v17  ;;  %v1335_v39 = vadd.f32 %v1334_v21, %v1333_v42 }
 0x6e1   : > { %v1743_v58 = vmul.f32 %v1718_v62, %v3995_v17  ;;  %v1352_v9 = vadd.f32 %v1351_v47, %v1350_v13  ;;  %v1761_v12 = vrot.slane %v1760_v32, 1  ;;  %v1348_v19 = vrot.slane %v1347_v61, 1 }
 0x6e2   : > { %v1340_v24 = vadd.f32 %v1339_v54, %v1338_v15  ;;  %v2185_v14 = vadd.f32 %v2184_v20, %v2183_v2  ;;  %v2204_v48 = vsel %vm2182_vm13, %v2177_v6, 0.0  ;;  %v3744_v23 = vadd.f32 %v2195_v8, %v2194_v49 }
 0x6e3   : > { %v1770_v57 = vsel %vm1748_vm11, %v1743_v58, 0.0  ;;  %v1299_v52 = vpop.permute.xlu0 %1298  ;;  %v1353_v35 = vrot.slane %v1352_v9, 2  ;;  %v2205_v27 = vrot.slane %v2204_v48, 4  ;;  %v3746_v4 = vadd.f32 %v2200_v60, %v2199_v41 }
 0x6e4   : > { %v1723_v26 = vpop.permute.xlu1 %1722  ;;  %v1771_v10 = vrot.slane %v1770_v57, 4  ;;  %v1341_v37 = vrot.slane %v1340_v24, 1  ;;  %v1312_v63 = vmul.f32 %v1299_v52, %v3995_v17  ;;  %v2186_v5 = vrot.slane %v2185_v14, 2 }
 0x6e5   : > { %v1744_v7 = vmul.f32 %v1723_v26, %v3995_v17  ;;  %v1354_v34 = vadd.f32 %v1353_v35, %v1352_v9  ;;  %v2206_v38 = vadd.f32 %v2205_v27, %v2204_v48  ;;  %v2266_v20 = vsel %vm618_vm4, %v1335_v39, %v2265_v59 }
 0x6e6   : > { %v1772_v44 = vadd.f32 %v1771_v10, %v1770_v57  ;;  %v1357_v36 = vsel %vm1314_vm12, %v1312_v63, 0.0  ;;  %v1342_v3 = vadd.f32 %v1341_v37, %v1340_v24  ;;  %v2187_v2 = vadd.f32 %v2186_v5, %v2185_v14 }
 0x6e7   : > { %v2157_v56 = vpop.permute.xlu0 %2156  ;;  %v1777_v1 = vsel %vm1748_vm11, %v1744_v7, 0.0  ;;  %v1358_v16 = vrot.slane %v1357_v36, 4  ;;  %v3751_v13 = vadd.f32 %v1761_v12, %v1760_v32  ;;  %v1355_v58 = vrot.slane %v1354_v34, 1 }
 0x6e8   : > { %v1728_v43 = vpop.permute.xlu1 %1727  ;;  %v2178_v51 = vmul.f32 %v2157_v56, %v3995_v17  ;;  %v1778_v54 = vrot.slane %v1777_v1, 4  ;;  %v1773_v50 = vrot.slane %v1772_v44, 2  ;;  %v1349_v29 = vadd.f32 %v1348_v19, %v1347_v61 }
 0x6e9   : > { %v1745_v15 = vmul.f32 %v1728_v43, %v3995_v17  ;;  %v1359_v30 = vadd.f32 %v1358_v16, %v1357_v36  ;;  %v2267_v25 = vsel %vm620_vm5, %v1342_v3, %v2266_v20  ;;  %v2188_v24 = vrot.slane %v2187_v2, 1 }
 0x6ea   : > { %v2211_v40 = vsel %vm2182_vm13, %v2178_v51, 0.0  ;;  %v2202_v14 = vrot.slane %v3746_v4, 1  ;;  %v2207_v9 = vrot.slane %v2206_v38, 2  ;;  %v1779_v26 = vadd.f32 %v1778_v54, %v1777_v1 }
 0x6eb   : > { %v1784_v62 = vsel %vm1748_vm11, %v1745_v15, 0.0  ;;  %v1304_v28 = vpop.permute.xlu0 %1303  ;;  %v1360_v47 = vrot.slane %v1359_v30, 2  ;;  %v2212_v6 = vrot.slane %v2211_v40, 4  ;;  %v2268_v32 = vsel %vm622_vm6, %v1349_v29, %v2267_v25 }
 0x6ec   : > { %v1733_v42 = vpop.permute.xlu1 %1732  ;;  %v1785_v57 = vrot.slane %v1784_v62, 4  ;;  %v1313_v18 = vmul.f32 %v1304_v28, %v3995_v17  ;;  %v1356_v52 = vadd.f32 %v1355_v58, %v1354_v34  ;;  %v3759_v11 = vadd.f32 %v1773_v50, %v1772_v44 }
 0x6ed   : > { %v1746_v49 = vmul.f32 %v1733_v42, %v3995_v17  ;;  %v1361_v10 = vadd.f32 %v1360_v47, %v1359_v30  ;;  %v2213_v48 = vadd.f32 %v2212_v6, %v2211_v40  ;;  %v3763_v7 = vadd.f32 %v2188_v24, %v2187_v2  ;;  %v2317_v24 = vld [vmem:[%s3964_s3] sm:$0xff] }
 0x6ee   : > { %v1364_v37 = vsel %vm1314_vm12, %v1313_v18, 0.0  ;;  %v1786_v63 = vadd.f32 %v1785_v57, %v1784_v62  ;;  %v2208_v5 = vadd.f32 %v2207_v9, %v2206_v38  ;;  %v1780_v43 = vrot.slane %v1779_v26, 2  ;;  %v2318_v57 = vld [vmem:[%s3964_s3 + $0x8] sm:$0xff] }
 0x6ef   : > { %v2162_v21 = vpop.permute.xlu0 %2161  ;;  %v1791_v35 = vsel %vm1748_vm11, %v1746_v49, 0.0  ;;  %v1365_v8 = vrot.slane %v1364_v37, 4  ;;  %v2269_v27 = vsel %vm624_vm7, %v1356_v52, %v2268_v32  ;;  %v1775_v56 = vrot.slane %v3759_v11, 1 }
 0x6f0   : > { %v1738_v41 = vpop.permute.xlu1 %1737  ;;  %v1792_v61 = vrot.slane %v1791_v35, 4  ;;  %v2179_v39 = vmul.f32 %v2162_v21, %v3995_v17  ;;  %v1362_v36 = vrot.slane %v1361_v10, 1  ;;  %v2214_v19 = vrot.slane %v2213_v48, 2 }
 0x6f1   : > { %v1747_v60 = vmul.f32 %v1738_v41, %v3995_v17  ;;  %v1366_v34 = vadd.f32 %v1365_v8, %v1364_v37  ;;  %v1787_v15 = vrot.slane %v1786_v63, 2  ;;  %v1781_v38 = vadd.f32 %v1780_v43, %v1779_v26 }
 0x6f2   : > { %v1793_v59 = vadd.f32 %v1792_v61, %v1791_v35  ;;  %v2218_v16 = vsel %vm2182_vm13, %v2179_v39, 0.0  ;;  %v2209_v28 = vrot.slane %v2208_v5, 1  ;;  %v1363_v29 = vadd.f32 %v1362_v36, %v1361_v10 }
 0x6f3   : > { %v1798_v44 = vsel %vm1748_vm11, %v1747_v60, 0.0  ;;  %v2167_v1 = vpop.permute.xlu0 %2166  ;;  %v1367_v2 = vrot.slane %v1366_v34, 2  ;;  %v2219_v51 = vrot.slane %v2218_v16, 4  ;;  %v2215_v25 = vadd.f32 %v2214_v19, %v2213_v48 }
 0x6f4   : > { %v2172_v12 = vpop.permute.xlu1 %2171  ;;  %v1799_v3 = vrot.slane %v1798_v44, 4  ;;  %v1794_v54 = vrot.slane %v1793_v59, 2  ;;  %v2180_v62 = vmul.f32 %v2167_v1, %v3995_v17  ;;  %v1788_v6 = vadd.f32 %v1787_v15, %v1786_v63 }
 0x6f5   : > { %v2181_v42 = vmul.f32 %v2172_v12, %v3995_v17  ;;  %v1368_v20 = vadd.f32 %v1367_v2, %v1366_v34  ;;  %v2220_v58 = vadd.f32 %v2219_v51, %v2218_v16  ;;  %v1782_v9 = vrot.slane %v1781_v38, 1 }
 0x6f6   : > { %v1800_v30 = vadd.f32 %v1799_v3, %v1798_v44  ;;  %v2225_v41 = vsel %vm2182_vm13, %v2180_v62, 0.0  ;;  %v1795_v26 = vadd.f32 %v1794_v54, %v1793_v59  ;;  %v2321_v10 = vpack.c.bf16 %v2318_v57, %v2317_v24 }
 0x6f7   : > { %v2232_v50 = vsel %vm2182_vm13, %v2181_v42, 0.0  ;;  %v1369_v49 = vrot.slane %v1368_v20, 1  ;;  %v2221_v17 = vrot.slane %v2220_v58, 2  ;;  %v2226_v21 = vrot.slane %v2225_v41, 4 }
 0x6f8   : > { %v1801_v47 = vrot.slane %v1800_v30, 2  ;;  %v2233_v40 = vrot.slane %v2232_v50, 4  ;;  %v2216_v48 = vrot.slane %v2215_v25, 1  ;;  %v2270_v8 = vsel %vm626_vm8, %v1363_v29, %v2269_v27  ;;  %2669 = vmatpush3.bf16.msra.mxu0 %v2321_v10 }
 0x6f9   : > { %v1370_v32 = vadd.f32 %v1369_v49, %v1368_v20  ;;  %v2222_v35 = vadd.f32 %v2221_v17, %v2220_v58  ;;  %v2227_v37 = vadd.f32 %v2226_v21, %v2225_v41  ;;  %v2283_v63 = vsel %vm616_vm3, %v3751_v13, %v3733_v31 }
 0x6fa   : > { %v2234_v18 = vadd.f32 %v2233_v40, %v2232_v50  ;;  %v1802_v52 = vadd.f32 %v1801_v47, %v1800_v30  ;;  %v1789_v60 = vrot.slane %v1788_v6, 1  ;;  %v1796_v59 = vrot.slane %v1795_v26, 1 }
 0x6fb   : > { %v2223_v43 = vrot.slane %v2222_v35, 1  ;;  %v2271_v39 = vsel %vm628_vm9, %v1370_v32, %v2270_v8  ;;  %v2228_v34 = vrot.slane %v2227_v37, 2  ;;  %v3996_v1 = vmov 0.0   ;;  %v3822_v32 = vld [vmem:[%s3968_s7] sm:$0x3f] }
 0x6fc   : > { %v2235_v61 = vrot.slane %v2234_v18, 2  ;;  %v2755_v44 = vpack.i.bf16 %v2271_v39, %v3729_v0  ;;  %2670 = vmatprep.subr.bf16.mxu0 %v3996_v1  ;;  %v2301_v27 = vsel %vm616_vm3, %v3744_v23, %v3763_v7  ;;  %v1776_v36 = vadd.f32 %v1775_v56, %v3759_v11  ;;  %v2319_v23 = vld [vmem:[%s3964_s3 + $0x10] sm:$0xff]  ;;  %v2320_v11 = vld [vmem:[%s3964_s3 + $0x18] sm:$0xff] }
 0x6fd   : > { %v2210_v19 = vadd.f32 %v2209_v28, %v2208_v5  ;;  %v1803_v31 = vrot.slane %v1802_v52, 1  ;;  %v2203_v13 = vadd.f32 %v2202_v14, %v3746_v4  ;;  %v1783_v3 = vadd.f32 %v1782_v9, %v1781_v38 }
 0x6fe   : > { %v2236_v12 = vadd.f32 %v2235_v61, %v2234_v18  ;;  %v2217_v16 = vadd.f32 %v2216_v48, %v2215_v25  ;;  %v2229_v15 = vadd.f32 %v2228_v34, %v2227_v37  ;;  %2756 = vrot.lane.b32.xlu0 %v2755_v44, %s2920_s22  ;;  %v2284_v0 = vsel %vm618_vm4, %v3738_v33, %v2283_v63  ;;  %v2846_v37 = vld [vmem:[%s3024_s21] sm:$0xff]  ;;  %v2396_v44 = vld [vmem:[%s3965_s4 + $0x8] sm:$0xff] }
 0x6ff   : > { %v1790_v2 = vadd.f32 %v1789_v60, %v1788_v6  ;;  %v2224_v51 = vadd.f32 %v2223_v43, %v2222_v35  ;;  %v2302_v4 = vsel %vm618_vm4, %v2203_v13, %v2301_v27  ;;  %v1797_v14 = vadd.f32 %v1796_v59, %v1795_v26  ;;  %v2397_v27 = vld [vmem:[%s3965_s4 + $0x10] sm:$0xff] }
 0x700   : > { %v2237_v42 = vrot.slane %v2236_v12, 1  ;;  %v2230_v7 = vrot.slane %v2229_v15, 1  ;;  %v2322_v5 = vpack.c.bf16 %v2320_v11, %v2319_v23  ;;  %v2285_v56 = vsel %vm620_vm5, %v1776_v36, %v2284_v0 }
 0x701   : > { %v2303_v33 = vsel %vm620_vm5, %v2210_v19, %v2302_v4  ;;  %v1804_v38 = vadd.f32 %v1803_v31, %v1802_v52  ;;  %v2286_v54 = vsel %vm622_vm6, %v1783_v3, %v2285_v56  ;;  %v2326_v52 = vrot.slane %v3822_v32, %v3339_v53  ;;  %v2395_v53 = vld [vmem:[%s3965_s4] sm:$0xff]  ;;  %v2398_v19 = vld [vmem:[%s3965_s4 + $0x18] sm:$0xff] }
 0x702   : > { %v2304_v30 = vsel %vm622_vm6, %v2217_v16, %v2303_v33  ;;  %v2231_v62 = vadd.f32 %v2230_v7, %v2229_v15  ;;  %2671 = vmatpush3.bf16.msra.mxu0 %v2322_v5  ;;  %v2287_v28 = vsel %vm624_vm7, %v1790_v2, %v2286_v54  ;;  %v2238_v58 = vadd.f32 %v2237_v42, %v2236_v12  ;;  %v2476_v4 = vld [vmem:[%s3966_s5] sm:$0xff]  ;;  %v2481_v33 = vld [vmem:[%s3966_s5 + $0x28] sm:$0xff]  ;;  %v2482_v54 = vld [vmem:[%s3966_s5 + $0x30] sm:$0xff] }
 0x703   : > { %v2305_v20 = vsel %vm624_vm7, %v2224_v51, %v2304_v30  ;;  %2676 = vmatprep.subr.bf16.mxu0 %v3996_v1  ;;  %v2288_v50 = vsel %vm626_vm8, %v1797_v14, %v2287_v28  ;;  %v2399_v36 = vpack.c.bf16 %v2396_v44, %v2395_v53  ;;  %v2400_v31 = vpack.c.bf16 %v2398_v19, %v2397_v27  ;;  %v2477_v14 = vld [vmem:[%s3966_s5 + $0x8] sm:$0xff]  ;;  %v2480_v56 = vld [vmem:[%s3966_s5 + $0x20] sm:$0xff]  ;;  %v2483_v30 = vld [vmem:[%s3966_s5 + $0x38] sm:$0xff] }
 0x704   : > { %v2306_v29 = vsel %vm626_vm8, %v2231_v62, %v2305_v20  ;;  %v2289_v25 = vsel %vm628_vm9, %v1804_v38, %v2288_v50  ;;  %v2387_v15 = vrot.slane %v3822_v32, %v3336_v45  ;;  %v2392_v51 = vrot.slane %v3822_v32, %v3345_v46  ;;  %v2478_v45 = vld [vmem:[%s3966_s5 + $0x10] sm:$0xff]  ;;  %v2479_v46 = vld [vmem:[%s3966_s5 + $0x18] sm:$0xff]  ;;  %v2484_v28 = vld [vmem:[%s3966_s5 + $0x40] sm:$0xff] }
 0x705   : > { %v2307_v47 = vsel %vm628_vm9, %v2238_v58, %v2306_v29  ;;  %v2492_v7 = vpack.c.bf16 %v2477_v14, %v2476_v4  ;;  %v2493_v5 = vpack.c.bf16 %v2479_v46, %v2478_v45  ;;  %v2494_v38 = vpack.c.bf16 %v2481_v33, %v2480_v56  ;;  %v2485_v20 = vld [vmem:[%s3966_s5 + $0x48] sm:$0xff]  ;;  %v2486_v50 = vld [vmem:[%s3966_s5 + $0x50] sm:$0xff]  ;;  %v2487_v29 = vld [vmem:[%s3966_s5 + $0x58] sm:$0xff] }
 0x706   : > { %v2760_v40 = vpack.i.bf16 %v2307_v47, %v2289_v25  ;;  %v2495_v62 = vpack.c.bf16 %v2483_v30, %v2482_v54  ;;  %v2496_v58 = vpack.c.bf16 %v2485_v20, %v2484_v28  ;;  %v2497_v25 = vpack.c.bf16 %v2487_v29, %v2486_v50  ;;  %v2488_v47 = vld [vmem:[%s3966_s5 + $0x60] sm:$0xff] }
 0x707   : > { %2685 = vmatpush3.bf16.msra.mxu1 %v2492_v7 }
 0x708   : > { %2761 = vrot.lane.b32.xlu1 %v2760_v40, %s2920_s22  ;;  %2686 = vmatprep.subr.bf16.mxu1 %v3996_v1  ;;  %v2489_v40 = vld [vmem:[%s3966_s5 + $0x68] sm:$0xff]  ;;  %s307_s22 = scalar_lea.vmem [#allocation2], %s2632_s19 }
 0x709   : > { %s2560_s23 = sshll.u32 %s307_s22, 4  ;;  %s3920_s23 = int_to_ptr.vmem [resolvable:$true] %s2560_s23 }
 0x70a   : > { %s2848_s26 = scalar_lea.vmem %s3920_s23, 128  ;;  %p2855_p0 = scmp.lt.s32.totalorder %s3920_s23, %s2853_s12 }
 0x70b   : > { %2687 = vmatpush3.bf16.msra.mxu1 %v2493_v5  ;;  %p2849_p11 = scmp.ne.s32.totalorder %s3920_s23, %s2848_s26  ;;  %p2856_p1 = scmp.lt.s32.totalorder %s2854_s13, %s2848_s26 }
 0x70c   : > { %2688 = vmatprep.subr.bf16.mxu1 %v3996_v1 }
 0x70d   : > { %p2850_p12 = pnand %p2849_p11, %p3006_p5  ;;  %p2857_p2 = por %p2856_p1, %p2855_p0 }
 0x70f   : > { %2689 = vmatpush3.bf16.msra.mxu1 %v2494_v38  ;;  %p2851_p13 = pneg %p2850_p12 }
 0x710   : > { %2690 = vmatprep.subr.bf16.mxu1 %v3996_v1 }
 0x711   : > { %p2858_p3 = pnand %p2857_p2, %p2851_p13 }
 0x713   : > { %2691 = vmatpush3.bf16.msra.mxu1 %v2495_v62 }
 0x714   : > { %2692 = vmatprep.subr.bf16.mxu1 %v3996_v1 }
 0x717   : > { %2693 = vmatpush3.bf16.msra.mxu1 %v2496_v58 }
 0x718   : > { %2694 = vmatprep.subr.bf16.mxu1 %v3996_v1 }
 0x71b   : > { %2695 = vmatpush3.bf16.msra.mxu1 %v2497_v25 }
 0x71c   : > { %2696 = vmatprep.subr.bf16.mxu1 %v3996_v1 }
 0x770   : > { %v2757_v24 = vpop.permute.xlu0 %2756 }
 0x771   : > { %v2759_v57 = vunpack.i.h.bf16 %v2757_v24  ;;  %v2758_v6 = vunpack.i.l.bf16 %v2757_v24  ;;  %v2498_v24 = vpack.c.bf16 %v2489_v40, %v2488_v47 }
 0x773   : > { %v2311_v9 = vsel %vm500_vm2, %v2758_v6, %v2759_v57  ;;  %v2490_v57 = vld [vmem:[%s3966_s5 + $0x70] sm:$0xff]  ;;  %v2491_v6 = vld [vmem:[%s3966_s5 + $0x78] sm:$0xff]  ;;  %2697 = vmatpush3.bf16.msra.mxu1 %v2498_v24 }
 0x774   : > { %2698 = vmatprep.subr.bf16.mxu1 %v3996_v1 }
 0x77a   : > { %v2762_v49 = vpop.permute.xlu1 %2761 }
 0x77b   : > { %v2764_v17 = vunpack.i.h.bf16 %v2762_v49  ;;  %v2763_v41 = vunpack.i.l.bf16 %v2762_v49  ;;  %v2499_v49 = vpack.c.bf16 %v2491_v6, %v2490_v57 }
 0x77d   : > { %v2313_v26 = vsel %vm2312_vm14, %v2311_v9, %v2763_v41  ;;  %2699 = vmatpush3.bf16.msra.mxu1 %v2499_v49 }
 0x77e   : > { %v2315_v18 = vsel %vm2314_vm15, %v2313_v26, %v2764_v17  ;;  %v2847_v17 = vld [vmem:[%s3967_s6] sm:$0x3] }
 0x77f   : > { %v2316_v21 = vpack.c.bf16 %v2315_v18, %v2315_v18  ;;  %v2404_v41 = vrot.slane %v2847_v17, %v3063_v22 }
 0x781   : > { %2673 = vmatmul.mubr.msk.bf16.vlgmr.msra.gmra.mrb[4].mxu0 %vm320_vm0, %v2316_v21 }
 0x782   : > { %2680 = vmatprep.mubr.msk.bf16.mxu0 %vm2913_vm1, %v3996_v1  ;;  %2677 = vmatpush3.bf16.msra.mxu0 %v2399_v36 }
 0x783   : > { %2678 = vmatprep.subr.bf16.mxu0 %v3996_v1 }
 0x786   : > { %2679 = vmatpush3.bf16.msra.mxu0 %v2400_v31 }
 0x854   : > { %v2364_v35 = vpop.f32.mrb[4].mxu0 }
 0x855   : > { %v2365_v10 = vadd.f32 %v2364_v35, %v2326_v52  ;;  %v2674_v48 = vpop.f32.mrb[5].mxu0 }
 0x856   : > { %v2367_v61 = vpop.f32.mrb[6].mxu0 }
 0x857   : > { %v3827_v8 = vadd.f32 %v2846_v37, %v2365_v10  ;;  %v2675_v63 = vpop.f32.mrb[7].mxu0 }
 0x859   : > { %v2371_v60 = vsel %vm320_vm0, %v3827_v8, 0.0 }
 0x85a   : > { %2372 = vadd.xlane.f32.xlu0 %v2371_v60 }
 0x8e7   : > { %v2373_v43 = vpop.xlane.xlu0 %2372 }
 0x8e8   : > { %v2374_v39 = vmul.f32 0.03125, %v2373_v43 }
 0x8ea   : > { %v2375_v59 = vsub.f32 %v3827_v8, %v2374_v39 }
 0x8ec   : > { %v2376_v12 = vmul.f32 %v2375_v59, %v2375_v59 }
 0x8ee   : > { %v2377_v34 = vsel %vm320_vm0, %v2376_v12, 0.0 }
 0x8ef   : > { %2378 = vadd.xlane.f32.xlu1 %v2377_v34 }
 0x97c   : > { %v2379_v13 = vpop.xlane.xlu1 %2378 }
 0x97d   : > { %v2380_v3 = vmul.f32 0.03125, %v2379_v13  ;;  %v2921_v13 = vmov -1.0  }
 0x97f   : > { %v2381_v16 = vadd.f32 1e-05, %v2380_v3 }
 0x981   : > { %2839 = vrsqrt.f32 %v2381_v16 }
 0x98b   : > { %v2840_v0 = vpop.eup %2839 }
 0x98c   : > { %v2383_v2 = vmul.f32 %v2840_v0, %v2375_v59 }
 0x98e   : > { %v2388_v42 = vmul.f32 %v2387_v15, %v2383_v2 }
 0x990   : > { %v2393_v23 = vadd.f32 %v2392_v51, %v2388_v42  ;;  %v2503_v42 = vrot.slane %v3822_v32, %v3342_v55 }
 0x992   : > { %v2394_v11 = vpack.c.bf16 %v2393_v23, %v2393_v23 }
 0x994   : > { %2681 = vmatmul.mubr.msk.bf16.vlgmr.msra.gmra.mrb[8].mxu0 %vm320_vm0, %v2394_v11 }
 0xa67   : > { %v2442_v9 = vpop.f32.mrb[8].mxu0 }
 0xa68   : > { %v2443_v26 = vadd.f32 %v2442_v9, %v2404_v41  ;;  %v2682_v18 = vpop.f32.mrb[9].mxu0 }
 0xa69   : > { %v2445_v21 = vpop.f32.mrb[10].mxu0 }
 0xa6a   : > { %v2449_v52 = vmul.f32 0.70710677, %v2443_v26  ;;  %v2683_v35 = vpop.f32.mrb[11].mxu0  ;;  %v2448_v15 = vmul.f32 0.5, %v2443_v26 }
 0xa6c   : > { %v2452_v10 = vand.u32 2147483647, %v2449_v52  ;;  %vm2450_vm1 = vcmp.ge.f32.partialorder %v2449_v52, 0.0 }
 0xa6d   : > { %v2451_v3 = vsel %vm2450_vm1, 1.0, %v2921_v13 }
 0xa6e   : > { %v2453_v48 = vmul.f32 0.3275911, %v2452_v10  ;;  %v2466_v37 = vsub.f32 0.0, %v2452_v10 }
 0xa70   : > { %v2454_v61 = vadd.f32 1.0, %v2453_v48  ;;  %v2467_v1 = vmul.f32 %v2466_v37, %v2452_v10 }
 0xa72   : > { %2841 = vrcp.f32 %v2454_v61  ;;  %v2468_v39 = vmul.f32 1.442695, %v2467_v1 }
 0xa74   : > { %2843 = vpow2.f32 %v2468_v39 }
 0xa7c   : > { %v2842_v63 = vpop.eup %2841 }
 0xa7d   : > { %v2457_v60 = vmul.f32 1.0614054, %v2842_v63 }
 0xa7e   : > { %v2844_v36 = vpop.eup %2843 }
 0xa7f   : > { %v2458_v43 = vadd.f32 -1.4531521, %v2457_v60 }
 0xa81   : > { %v2459_v59 = vmul.f32 %v2842_v63, %v2458_v43 }
 0xa83   : > { %v2460_v12 = vadd.f32 1.4214138, %v2459_v59 }
 0xa85   : > { %v2461_v22 = vmul.f32 %v2842_v63, %v2460_v12 }
 0xa87   : > { %v2462_v34 = vadd.f32 -0.28449672, %v2461_v22 }
 0xa89   : > { %v2463_v53 = vmul.f32 %v2842_v63, %v2462_v34 }
 0xa8b   : > { %v2464_v44 = vadd.f32 0.2548296, %v2463_v53 }
 0xa8d   : > { %v2465_v27 = vmul.f32 %v2842_v63, %v2464_v44 }
 0xa8f   : > { %v2470_v19 = vmul.f32 %v2844_v36, %v2465_v27 }
 0xa91   : > { %v2471_v31 = vsub.f32 1.0, %v2470_v19 }
 0xa93   : > { %v2472_v16 = vmul.f32 %v2471_v31, %v2451_v3 }
 0xa95   : > { %v2473_v0 = vadd.f32 1.0, %v2472_v16 }
 0xa97   : > { %v2474_v2 = vmul.f32 %v2473_v0, %v2448_v15 }
 0xa99   : > { %v2475_v51 = vpack.c.bf16 %v2474_v2, %v2474_v2 }
 0xa9b   : > { %2701 = vmatmul.mubr.bf16.vlgmr.msra.gmra.mrb[0].mxu1 %v2475_v51 }
 0xb6e   : > { %v2538_v23 = vpop.f32.mrb[0].mxu1 }
 0xb6f   : > { %v2539_v11 = vadd.f32 %v2538_v23, %v2503_v42  ;;  %v2702_v4 = vpop.f32.mrb[1].mxu1 }
 0xb70   : > { %v2541_v14 = vpop.f32.mrb[2].mxu1 }
 0xb71   : > { %v2544_v7 = vadd.f32 %v2539_v11, %v3827_v8  ;;  %v2703_v45 = vpop.f32.mrb[3].mxu1 }
 0xb73   : > { %2545 = vst.msk [vmem:[%s307_s22] sm:$0xff] %vm320_vm0, %v2544_v7 }
 0xb74   : > { %2861 = shalt.err (!%p2858_p3)
}
 0xb75   : > { %s2862_s21 = scalar_lea.hbm %s3918_s25, 128  ;;  %s2866_s20 = scalar_lea.hbm %s3969_s8, 256 }
 0xb76   : > { %p2863_p4 = scmp.ne.s32.totalorder %s3918_s25, %s2862_s21  ;;  %p2867_p9 = scmp.lt.u32.totalorder %s3918_s25, %s3969_s8 }
 0xb77   : > { %p2868_p10 = scmp.lt.u32.totalorder %s2866_s20, %s2862_s21  ;;  %p2870_p12 = scmp.lt.u32.totalorder %s2862_s21, %s3918_s25 }
 0xb78   : > { %p2864_p7 = pnand %p2863_p4, %p3006_p5 }
 0xb79   : > { %p2869_p11 = por %p2868_p10, %p2867_p9 }
 0xb7a   : > { %p2865_p8 = pneg %p2864_p7 }
 0xb7b   : > { %p2871_p13 = por %p2870_p12, %p2869_p11 }
 0xb7d   : > { %p2872_p0 = pnand %p2871_p13, %p2865_p8 }
 0xb7f   : > { %2875 = shalt.err (!%p2872_p0)
}
 0xb80   : > { %2704 = dma.vmem_to_hbm [thread:$0]  (%p3006_p5), %s3920_s23, 128, %s3918_s25, %s2547_s9  }
 0xb81 PF: > { %p2710_p1 = scmp.ge.s32.totalorder %s2910_s30, 2  ;;  %s2572_s24 = sand.u32 1, %s2898_s27  }
 0xb82   : > { %s2573_s26 = scalar_lea.sflag [#allocation3], %s2572_s24 }
 0xb83   : > { %p2707_p2 = pnand %p2710_p1, %p3010_p6 }
 0xb85   : > { %2893 = dma.done.wait (!%p2707_p2), %s2573_s26, 128  }
 0xb86   : > { %2895 = vsyncadd (!%p2707_p2), %s2573_s26, 4294967168  ;;  %p18_p3 = scmp.ge.s32.totalorder %s2993_s11, 4   ;;  %s3997_s27 = smov %s2902_s28 }
 0xb87   : > { %s3998_s28 = smov %s2906_s29  ;;  %s3999_s29 = smov %s3004_s14 }
 0xb88   : > { %s4000_s30 = smov %s2993_s11  ;;  %20 = sbr.rel (!%p18_p3) target bundleno = 3 (0x3), region = 90 }
 0xb8f   :  { %2578 = vsyncpa [#allocation3], 1 }
 0xb90   :  { %2580 = vsyncpa [#allocation3 + $0x1], 1 }

</bundles_post_ra>
